<compile_context>
chip_gen: v7x
topology: tpu7x:2x2x1
jax: 0.10.0
libtpu: 0.0.40
codegen_flags: <defaults>
</compile_context>

<pallas_src>
import functools

import jax
import jax.numpy as jnp
from jax.experimental import pallas as pl
from jax.experimental.pallas import tpu as pltpu


def _round_up(x, m):
    return ((x + m - 1) // m) * m


def _choose_tile_m(m):
    """Largest lane-dense pixel tile (power of two, multiple of 128, <= 8192)."""
    t = 8192
    while t > 128 and t >= m:
        t //= 2
    return t


# ---------------------------------------------------------------------------
# Fused Pallas kernel:
#   manual double-buffered halo DMA -> in-kernel 3x3 patch slices ->
#   9 accumulated MXU matmuls + bias + ReLU -> 1x1 conv (VPU reduce) ->
#   lane-dense density store + masked MSE accumulation
# ---------------------------------------------------------------------------
def _fused_kernel(x_hbm, gt_ref, msk_ref, w1_ref, b1_ref, w2_ref, b2_ref,
                  dens_ref, loss_ref, xbuf, sem, *,
                  tile_m, halo, wp, cp, inv_count):
    """One grid step = TILE_M output pixels (padded-flat coordinates).

    x_hbm   : (Cp, halo + P_pad + halo) bf16  HBM (pl.ANY), manual DMA
    gt_ref  : (1, TILE_M)  f32   ground truth (padded-flat layout)
    msk_ref : (1, TILE_M)  f32   1.0 on real pixels, 0.0 on padding
    w1_ref  : (9*hid, Cp)  bf16  conv3x3 weights, one (hid, Cp) block per offset
    b1_ref  : (hid, 1)     f32   conv3x3 bias (column), VMEM-resident
    w2_ref  : (hid, 1)     f32   conv1x1 weights (column), VMEM-resident
    b2_ref  : (1,)         f32   conv1x1 bias, SMEM scalar
    dens_ref: (1, TILE_M)  f32   lane-dense density tile
    loss_ref: (1, 1)       f32   revisited accumulator -> MSE loss
    xbuf    : (2, Cp, TILE_M + 2*halo) bf16  double-buffered halo window
    sem     : DMA semaphores, shape (2,)
    """
    i = pl.program_id(0)
    nsteps = pl.num_programs(0)
    win = tile_m + 2 * halo
    hid = b1_ref.shape[0]

    def start_fetch(step, slot):
        off = pl.multiple_of(step * tile_m, 128)
        pltpu.make_async_copy(x_hbm.at[:, pl.ds(off, win)],
                              xbuf.at[slot], sem.at[slot]).start()

    @pl.when(i == 0)
    def _init():
        loss_ref[...] = jnp.zeros_like(loss_ref)
        start_fetch(i, 0)              # prime slot 0

    slot = i % 2

    @pl.when(i + 1 < nsteps)
    def _prefetch():
        start_fetch(i + 1, 1 - slot)   # prefetch next tile into the other slot

    # wait for the current tile's halo window
    pltpu.make_async_copy(x_hbm.at[:, pl.ds(0, win)],
                          xbuf.at[slot], sem.at[slot]).wait()

    xt = xbuf[slot]                    # (Cp, win) bf16
    w1 = w1_ref[...]                   # (9*hid, Cp) bf16

    # conv3x3 as nine (hid, Cp) x (Cp, TILE_M) MXU matmuls over shifted slices
    acc = None
    for idx in range(9):
        dy, dx = idx // 3, idx % 3
        s = halo + (dy - 1) * wp + (dx - 1)          # static lane offset
        xs = xt[:, s:s + tile_m]                     # (Cp, TILE_M)
        wsub = w1[idx * hid:(idx + 1) * hid, :]      # (hid, Cp)
        part = jnp.dot(wsub, xs, preferred_element_type=jnp.float32)
        acc = part if acc is None else acc + part

    h = jnp.maximum(acc + b1_ref[...], 0.0)          # (hid, TILE_M) f32

    # conv1x1 (single output channel): VPU multiply + sublane reduction
    o = jnp.sum(h * w2_ref[...], axis=0, keepdims=True) + b2_ref[0]
    dens_ref[...] = o

    # fused MSE: padded-flat positions outside the real image are masked out
    diff = jnp.where(msk_ref[...] > 0.5, o - gt_ref[...], 0.0)
    loss_ref[...] = loss_ref[...] + jnp.sum(diff * diff)

    @pl.when(i == nsteps - 1)
    def _final():
        loss_ref[...] = loss_ref[...] * inv_count


# ---------------------------------------------------------------------------
# Reference-only helper: transposed im2col for a 3x3 "same" conv (NHWC input)
# ---------------------------------------------------------------------------
def _im2col_3x3_T(x_nhwc):
    n, h, w, c = x_nhwc.shape
    xp = jnp.pad(x_nhwc, ((0, 0), (1, 1), (1, 1), (0, 0)))
    xp_t = jnp.transpose(xp, (3, 0, 1, 2))            # (C, N, H+2, W+2)
    rows = []
    for dy in range(3):
        for dx in range(3):
            rows.append(xp_t[:, :, dy:dy + h, dx:dx + w].reshape(c, n * h * w))
    return jnp.concatenate(rows, axis=0)               # (9C, M)


# ---------------------------------------------------------------------------
# The CrowdCounter equivalent
# ---------------------------------------------------------------------------
class CrowdCounterPallas:
    def __init__(self, in_channels=4, hidden=32, key=jax.random.PRNGKey(42)):
        k1, k2, k3, k4 = jax.random.split(key, 4)
        kdim = 9 * in_channels
        # deterministic synthetic parameters (no checkpoint load)
        self.w1 = (jax.random.normal(k1, (kdim, hidden), jnp.float32)
                   * (1.0 / jnp.sqrt(kdim)))
        self.b1 = 0.1 * jax.random.normal(k3, (hidden,), jnp.float32)
        self.w2 = (jax.random.normal(k2, (hidden,), jnp.float32)
                   * (1.0 / jnp.sqrt(hidden)))
        self.b2 = 0.1 * jax.random.normal(k4, (1,), jnp.float32)
        self.loss_mse = None

    # ---- fused CCN + MSE (single gridded pallas_call) ---------------------
    def _fused(self, img_nchw, gt_nhw):
        n, c, h, w = img_nchw.shape
        hp, wp = h + 2, w + 2
        p = n * hp * wp                       # pixels in padded-flat coords
        cp = _round_up(c, 8)                  # channel pad for clean layout
        hid = self.w1.shape[1]

        tile_m = _choose_tile_m(p)
        num_tiles = -(-p // tile_m)           # ceil div
        p_pad = num_tiles * tile_m
        halo = _round_up(wp + 1, 128)         # lane halo covering all 9 shifts
        win = tile_m + 2 * halo

        # -- input: channel-major, spatially zero-padded, flattened, bf16 ----
        x_cnhw = jnp.transpose(img_nchw, (1, 0, 2, 3)).astype(jnp.float32)
        x_pad = jnp.pad(x_cnhw, ((0, cp - c), (0, 0), (1, 1), (1, 1)))
        x_flat = x_pad.reshape(cp, p)
        x_flat = jnp.pad(x_flat, ((0, 0), (halo, (p_pad - p) + halo)))
        x_flat = x_flat.astype(jnp.bfloat16)  # (cp, halo + p_pad + halo)

        # -- ground truth + validity mask in padded-flat coordinates ---------
        gt_pad = jnp.pad(gt_nhw.astype(jnp.float32), ((0, 0), (1, 1), (1, 1)))
        gt2 = jnp.pad(gt_pad.reshape(1, p), ((0, 0), (0, p_pad - p)))
        msk_pad = jnp.pad(jnp.ones((n, h, w), jnp.float32),
                          ((0, 0), (1, 1), (1, 1)))
        msk2 = jnp.pad(msk_pad.reshape(1, p), ((0, 0), (0, p_pad - p)))

        # -- weights: (9*hid, cp) with zero-padded channels -------------------
        w1_9 = self.w1.reshape(9, c, hid)
        w1_9 = jnp.pad(w1_9, ((0, 0), (0, cp - c), (0, 0)))
        w1b = jnp.transpose(w1_9, (0, 2, 1)).reshape(9 * hid, cp)
        w1b = w1b.astype(jnp.bfloat16)
        b1c = self.b1.reshape(hid, 1).astype(jnp.float32)
        w2c = self.w2.reshape(hid, 1).astype(jnp.float32)
        b2s = self.b2.astype(jnp.float32)                  # (1,) -> SMEM

        kernel = functools.partial(
            _fused_kernel, tile_m=tile_m, halo=halo, wp=wp, cp=cp,
            inv_count=1.0 / float(n * h * w))

        dens, loss = pl.pallas_call(
            kernel,
            grid=(num_tiles,),
            in_specs=[
                pl.BlockSpec(memory_space=pl.ANY),                  # x (manual DMA)
                pl.BlockSpec((1, tile_m), lambda i: (0, i)),        # gt tile
                pl.BlockSpec((1, tile_m), lambda i: (0, i)),        # mask tile
                pl.BlockSpec((9 * hid, cp), lambda i: (0, 0)),      # w1 (resident)
                pl.BlockSpec((hid, 1), lambda i: (0, 0)),           # b1 (resident)
                pl.BlockSpec((hid, 1), lambda i: (0, 0)),           # w2 (resident)
                pl.BlockSpec(memory_space=pltpu.MemorySpace.SMEM),  # b2 scalar
            ],
            out_specs=(
                pl.BlockSpec((1, tile_m), lambda i: (0, i)),        # density
                pl.BlockSpec((1, 1), lambda i: (0, 0)),             # loss (revisited)
            ),
            out_shape=(
                jax.ShapeDtypeStruct((1, p_pad), jnp.float32),
                jax.ShapeDtypeStruct((1, 1), jnp.float32),
            ),
            scratch_shapes=[
                pltpu.VMEM((2, cp, win), jnp.bfloat16),   # double-buffered halo window
                pltpu.SemaphoreType.DMA((2,)),
            ],
            compiler_params=pltpu.CompilerParams(
                dimension_semantics=("arbitrary",),   # loss accumulates over tiles
                vmem_limit_bytes=64 * 1024 * 1024,
            ),
        )(x_flat, gt2, msk2, w1b, b1c, w2c, b2s)

        dens_map = dens[0, :p].reshape(n, hp, wp)[:, 1:1 + h, 1:1 + w]
        return dens_map[:, None, :, :], loss[0, 0]

    # ---- forward(img, gt_map) ---------------------------------------------
    def forward(self, img, gt_map):
        # density map of the synthetic CCN has the same spatial size as img
        if img.shape[-2] != gt_map.shape[-2]:
            print('Warning, 8* downsample upsample size mismatch')
            return 'None'
        density_map, loss = self._fused(img, gt_map)
        self.loss_mse = loss
        return density_map

    @property
    def loss(self):
        return self.loss_mse

    def test_forward(self, img):
        n, c, h, w = img.shape
        dm, _ = self._fused(img, jnp.zeros((n, h, w), jnp.float32))
        return dm


# ---------------------------------------------------------------------------
if __name__ == "__main__":
    key = jax.random.PRNGKey(0)
    k_img, k_gt = jax.random.split(key)

    # small shapes consistent with the module: NCHW image, per-pixel gt map
    img = jax.random.normal(k_img, (2, 4, 16, 16), jnp.float32)
    gt_map = jax.random.uniform(k_gt, (2, 16, 16), jnp.float32)

    model = CrowdCounterPallas(in_channels=4, hidden=32)
    density_map = model.forward(img, gt_map)
    density_map = jax.block_until_ready(density_map)
    loss = jax.block_until_ready(model.loss)

    # plain-JAX reference using the same bf16 inputs / f32 accumulation
    def ref_fwd(img_nchw, gt):
        n, c, h, w = img_nchw.shape
        x_nhwc = jnp.transpose(img_nchw, (0, 2, 3, 1)).astype(jnp.float32)
        xT = _im2col_3x3_T(x_nhwc).astype(jnp.bfloat16)
        hh = jnp.dot(jnp.transpose(model.w1).astype(jnp.bfloat16), xT,
                     preferred_element_type=jnp.float32)
        hh = jnp.maximum(hh + model.b1[:, None], 0.0)
        o = jnp.sum(hh * model.w2[:, None], axis=0) + model.b2[0]
        dm = o.reshape(n, h, w)[:, None, :, :]
        ls = jnp.mean((o.reshape(n, h, w) - gt) ** 2)
        return dm, ls

    ref_dm, ref_loss = ref_fwd(img, gt_map)

    assert density_map.shape == (2, 1, 16, 16), density_map.shape
    assert jnp.allclose(density_map, ref_dm, atol=2e-3, rtol=2e-3), (
        float(jnp.max(jnp.abs(density_map - ref_dm))))
    assert jnp.allclose(loss, ref_loss, atol=5e-4, rtol=1e-3), (
        float(loss), float(ref_loss))

    # test_forward path (no gt / no loss)
    dm2 = jax.block_until_ready(model.test_forward(img))
    assert jnp.allclose(dm2, ref_dm, atol=2e-3, rtol=2e-3)

    print("KERNEL_OK")
</pallas_src>

<mosaic_0001>
module attributes {stable_mosaic.version = 11 : i64} {
  func.func @_fused_kernel(%arg0: i32, %arg1: memref<8x1280xbf16, #tpu.memory_space<any>>, %arg2: memref<1x512xf32, #tpu.memory_space<vmem>>, %arg3: memref<1x512xf32, #tpu.memory_space<vmem>>, %arg4: memref<288x8xbf16, #tpu.memory_space<vmem>>, %arg5: memref<32x1xf32, #tpu.memory_space<vmem>>, %arg6: memref<32x1xf32, #tpu.memory_space<vmem>>, %arg7: memref<1xf32, #tpu.memory_space<smem>>, %arg8: memref<1x512xf32, #tpu.memory_space<vmem>>, %arg9: memref<1x1xf32, #tpu.memory_space<vmem>>, %arg10: memref<2x8x768xbf16, #tpu.memory_space<vmem>>, %arg11: memref<2x!tpu.dma_semaphore, #tpu.memory_space<semaphore_mem>>) attributes {dimension_semantics = [#tpu.dimension_semantics<arbitrary>], iteration_bounds = array<i64: 2>, scalar_prefetch = 0 : i64, scratch_operands = 2 : i64, tpu.core_type = #tpu.core_type<tc>, window_params = [{}, {transform_indices = @transform_1, window_bounds = array<i64: 1, 512>}, {transform_indices = @transform_2, window_bounds = array<i64: 1, 512>}, {pipeline_mode = #tpu.pipeline_mode<synchronous>, transform_indices = @transform_3, window_bounds = array<i64: 288, 8>}, {pipeline_mode = #tpu.pipeline_mode<synchronous>, transform_indices = @transform_4, window_bounds = array<i64: 32, 1>}, {pipeline_mode = #tpu.pipeline_mode<synchronous>, transform_indices = @transform_5, window_bounds = array<i64: 32, 1>}, {transform_indices = @transform_6, window_bounds = array<i64: 1>}, {transform_indices = @transform_7, window_bounds = array<i64: 1, 512>}, {pipeline_mode = #tpu.pipeline_mode<synchronous>, transform_indices = @transform_8, window_bounds = array<i64: 1, 1>}]} {
    %c0_i32 = arith.constant 0 : i32
    %0 = arith.cmpi eq, %arg0, %c0_i32 : i32
    %1 = arith.extui %0 : i1 to i32
    %c0_i32_0 = arith.constant 0 : i32
    %2 = arith.cmpi ne, %1, %c0_i32_0 : i32
    scf.if %2 {
      %cst_45 = arith.constant 0.000000e+00 : f32
      %94 = vector.broadcast %cst_45 : f32 to vector<1x1xf32>
      %c0_46 = arith.constant 0 : index
      %c0_47 = arith.constant 0 : index
      %95 = vector.load %arg9[%c0_46, %c0_47] : memref<1x1xf32, #tpu.memory_space<vmem>>, vector<1x1xf32>
      tpu.vector_store %arg9[%c0_46, %c0_47], %94 {strides = array<i32>} : memref<1x1xf32, #tpu.memory_space<vmem>>, vector<1x1xf32>,
      %c512_i32 = arith.constant 512 : i32
      %96 = arith.muli %arg0, %c512_i32 : i32
      %97 = tpu.assume_multiple %96, 128 : i32
      %c0_i32_48 = arith.constant 0 : i32
      %c0_i32_49 = arith.constant 0 : i32
      %c0_i32_50 = arith.constant 0 : i32
      %98 = tpu.memref_slice %arg1[%c0_i32_50, %97] : memref<8x1280xbf16, #tpu.memory_space<any>> -> memref<8x768xbf16, #tpu.memory_space<any>>
      %c0_i32_51 = arith.constant 0 : i32
      %c0_i32_52 = arith.constant 0 : i32
      %99 = tpu.memref_slice %arg10[%c0_i32_48, %c0_i32_51, %c0_i32_52] : memref<2x8x768xbf16, #tpu.memory_space<vmem>> -> memref<1x8x768xbf16, #tpu.memory_space<vmem>>
      %100 = tpu.memref_squeeze %99 : memref<1x8x768xbf16, #tpu.memory_space<vmem>> -> memref<8x768xbf16, #tpu.memory_space<vmem>>
      %101 = tpu.memref_slice %arg11[%c0_i32_49] : memref<2x!tpu.dma_semaphore, #tpu.memory_space<semaphore_mem>> -> memref<1x!tpu.dma_semaphore, #tpu.memory_space<semaphore_mem>>
      %102 = tpu.memref_squeeze %101 : memref<1x!tpu.dma_semaphore, #tpu.memory_space<semaphore_mem>> -> memref<!tpu.dma_semaphore, #tpu.memory_space<semaphore_mem>>
      tpu.enqueue_dma source(%98 : memref<8x768xbf16, #tpu.memory_space<any>>) target(%100 : memref<8x768xbf16, #tpu.memory_space<vmem>>) target_semaphore(%102 : memref<!tpu.dma_semaphore, #tpu.memory_space<semaphore_mem>>)
    } else {
    }
    %c2_i32 = arith.constant 2 : i32
    %c0_i32_1 = arith.constant 0 : i32
    %3 = arith.cmpi eq, %c2_i32, %c0_i32_1 : i32
    %c1_i32 = arith.constant 1 : i32
    %4 = arith.select %3, %c1_i32, %c2_i32 : i32
    %5 = arith.remsi %arg0, %4 : i32
    %c0_i32_2 = arith.constant 0 : i32
    %6 = arith.cmpi ne, %5, %c0_i32_2 : i32
    %c0_i32_3 = arith.constant 0 : i32
    %7 = arith.cmpi slt, %5, %c0_i32_3 : i32
    %c0_i32_4 = arith.constant 0 : i32
    %8 = arith.cmpi slt, %4, %c0_i32_4 : i32
    %9 = arith.xori %7, %8 : i1
    %10 = arith.andi %9, %6 : i1
    %11 = arith.addi %5, %4 : i32
    %12 = arith.select %10, %11, %5 : i32
    %c1_i32_5 = arith.constant 1 : i32
    %13 = arith.addi %arg0, %c1_i32_5 : i32
    %c2_i32_6 = arith.constant 2 : i32
    %14 = arith.cmpi slt, %13, %c2_i32_6 : i32
    %15 = arith.extui %14 : i1 to i32
    %c0_i32_7 = arith.constant 0 : i32
    %16 = arith.cmpi ne, %15, %c0_i32_7 : i32
    scf.if %16 {
      %c1_i32_45 = arith.constant 1 : i32
      %94 = arith.addi %arg0, %c1_i32_45 : i32
      %c1_i32_46 = arith.constant 1 : i32
      %95 = arith.subi %c1_i32_46, %12 : i32
      %c512_i32 = arith.constant 512 : i32
      %96 = arith.muli %94, %c512_i32 : i32
      %97 = tpu.assume_multiple %96, 128 : i32
      %c0_i32_47 = arith.constant 0 : i32
      %98 = tpu.memref_slice %arg1[%c0_i32_47, %97] : memref<8x1280xbf16, #tpu.memory_space<any>> -> memref<8x768xbf16, #tpu.memory_space<any>>
      %c0_i32_48 = arith.constant 0 : i32
      %c0_i32_49 = arith.constant 0 : i32
      %99 = tpu.memref_slice %arg10[%95, %c0_i32_48, %c0_i32_49] : memref<2x8x768xbf16, #tpu.memory_space<vmem>> -> memref<1x8x768xbf16, #tpu.memory_space<vmem>>
      %100 = tpu.memref_squeeze %99 : memref<1x8x768xbf16, #tpu.memory_space<vmem>> -> memref<8x768xbf16, #tpu.memory_space<vmem>>
      %101 = tpu.memref_slice %arg11[%95] : memref<2x!tpu.dma_semaphore, #tpu.memory_space<semaphore_mem>> -> memref<1x!tpu.dma_semaphore, #tpu.memory_space<semaphore_mem>>
      %102 = tpu.memref_squeeze %101 : memref<1x!tpu.dma_semaphore, #tpu.memory_space<semaphore_mem>> -> memref<!tpu.dma_semaphore, #tpu.memory_space<semaphore_mem>>
      tpu.enqueue_dma source(%98 : memref<8x768xbf16, #tpu.memory_space<any>>) target(%100 : memref<8x768xbf16, #tpu.memory_space<vmem>>) target_semaphore(%102 : memref<!tpu.dma_semaphore, #tpu.memory_space<semaphore_mem>>)
    } else {
    }
    %c0_i32_8 = arith.constant 0 : i32
    %c0_i32_9 = arith.constant 0 : i32
    %17 = tpu.memref_slice %arg1[%c0_i32_8, %c0_i32_9] : memref<8x1280xbf16, #tpu.memory_space<any>> -> memref<8x768xbf16, #tpu.memory_space<any>>
    %c0_i32_10 = arith.constant 0 : i32
    %c0_i32_11 = arith.constant 0 : i32
    %18 = tpu.memref_slice %arg10[%12, %c0_i32_10, %c0_i32_11] : memref<2x8x768xbf16, #tpu.memory_space<vmem>> -> memref<1x8x768xbf16, #tpu.memory_space<vmem>>
    %19 = tpu.memref_squeeze %18 : memref<1x8x768xbf16, #tpu.memory_space<vmem>> -> memref<8x768xbf16, #tpu.memory_space<vmem>>
    %20 = tpu.memref_slice %arg11[%12] : memref<2x!tpu.dma_semaphore, #tpu.memory_space<semaphore_mem>> -> memref<1x!tpu.dma_semaphore, #tpu.memory_space<semaphore_mem>>
    %21 = tpu.memref_squeeze %20 : memref<1x!tpu.dma_semaphore, #tpu.memory_space<semaphore_mem>> -> memref<!tpu.dma_semaphore, #tpu.memory_space<semaphore_mem>>
    tpu.wait_dma2 semaphore(%21 : memref<!tpu.dma_semaphore, #tpu.memory_space<semaphore_mem>>) src(%17 : memref<8x768xbf16, #tpu.memory_space<any>>) dst(%19 : memref<8x768xbf16, #tpu.memory_space<vmem>>)
    %22 = arith.index_cast %12 : i32 to index
    %c0 = arith.constant 0 : index
    %c0_12 = arith.constant 0 : index
    %23 = vector.load %arg10[%22, %c0, %c0_12] : memref<2x8x768xbf16, #tpu.memory_space<vmem>>, vector<1x8x768xbf16>
    %24 = vector.shape_cast %23 : vector<1x8x768xbf16> to vector<8x768xbf16>
    %c0_13 = arith.constant 0 : index
    %c0_14 = arith.constant 0 : index
    %25 = vector.load %arg4[%c0_13, %c0_14] : memref<288x8xbf16, #tpu.memory_space<vmem>>, vector<288x8xbf16>
    %26 = vector.extract_strided_slice %24 {offsets = [0, 109], sizes = [8, 512], strides = [1, 1]} : vector<8x768xbf16> to vector<8x512xbf16>
    %27 = vector.extract_strided_slice %25 {offsets = [0, 0], sizes = [32, 8], strides = [1, 1]} : vector<288x8xbf16> to vector<32x8xbf16>
    %cst = arith.constant dense<0.000000e+00> : vector<32x512xf32>
    %28 = tpu.matmul %27, %26, %cst {dimension_numbers = #tpu.dot_dimension_numbers<[1], [0], [0], [1], [0, 0, 1, 1], [], []>} : vector<32x8xbf16>, vector<8x512xbf16>, vector<32x512xf32> -> vector<32x512xf32>
    %29 = vector.extract_strided_slice %24 {offsets = [0, 110], sizes = [8, 512], strides = [1, 1]} : vector<8x768xbf16> to vector<8x512xbf16>
    %30 = vector.extract_strided_slice %25 {offsets = [32, 0], sizes = [32, 8], strides = [1, 1]} : vector<288x8xbf16> to vector<32x8xbf16>
    %cst_15 = arith.constant dense<0.000000e+00> : vector<32x512xf32>
    %31 = tpu.matmul %30, %29, %cst_15 {dimension_numbers = #tpu.dot_dimension_numbers<[1], [0], [0], [1], [0, 0, 1, 1], [], []>} : vector<32x8xbf16>, vector<8x512xbf16>, vector<32x512xf32> -> vector<32x512xf32>
    %32 = arith.addf %28, %31 : vector<32x512xf32>
    %33 = vector.extract_strided_slice %24 {offsets = [0, 111], sizes = [8, 512], strides = [1, 1]} : vector<8x768xbf16> to vector<8x512xbf16>
    %34 = vector.extract_strided_slice %25 {offsets = [64, 0], sizes = [32, 8], strides = [1, 1]} : vector<288x8xbf16> to vector<32x8xbf16>
    %cst_16 = arith.constant dense<0.000000e+00> : vector<32x512xf32>
    %35 = tpu.matmul %34, %33, %cst_16 {dimension_numbers = #tpu.dot_dimension_numbers<[1], [0], [0], [1], [0, 0, 1, 1], [], []>} : vector<32x8xbf16>, vector<8x512xbf16>, vector<32x512xf32> -> vector<32x512xf32>
    %36 = arith.addf %32, %35 : vector<32x512xf32>
    %37 = vector.extract_strided_slice %24 {offsets = [0, 127], sizes = [8, 512], strides = [1, 1]} : vector<8x768xbf16> to vector<8x512xbf16>
    %38 = vector.extract_strided_slice %25 {offsets = [96, 0], sizes = [32, 8], strides = [1, 1]} : vector<288x8xbf16> to vector<32x8xbf16>
    %cst_17 = arith.constant dense<0.000000e+00> : vector<32x512xf32>
    %39 = tpu.matmul %38, %37, %cst_17 {dimension_numbers = #tpu.dot_dimension_numbers<[1], [0], [0], [1], [0, 0, 1, 1], [], []>} : vector<32x8xbf16>, vector<8x512xbf16>, vector<32x512xf32> -> vector<32x512xf32>
    %40 = arith.addf %36, %39 : vector<32x512xf32>
    %41 = vector.extract_strided_slice %24 {offsets = [0, 128], sizes = [8, 512], strides = [1, 1]} : vector<8x768xbf16> to vector<8x512xbf16>
    %42 = vector.extract_strided_slice %25 {offsets = [128, 0], sizes = [32, 8], strides = [1, 1]} : vector<288x8xbf16> to vector<32x8xbf16>
    %cst_18 = arith.constant dense<0.000000e+00> : vector<32x512xf32>
    %43 = tpu.matmul %42, %41, %cst_18 {dimension_numbers = #tpu.dot_dimension_numbers<[1], [0], [0], [1], [0, 0, 1, 1], [], []>} : vector<32x8xbf16>, vector<8x512xbf16>, vector<32x512xf32> -> vector<32x512xf32>
    %44 = arith.addf %40, %43 : vector<32x512xf32>
    %45 = vector.extract_strided_slice %24 {offsets = [0, 129], sizes = [8, 512], strides = [1, 1]} : vector<8x768xbf16> to vector<8x512xbf16>
    %46 = vector.extract_strided_slice %25 {offsets = [160, 0], sizes = [32, 8], strides = [1, 1]} : vector<288x8xbf16> to vector<32x8xbf16>
    %cst_19 = arith.constant dense<0.000000e+00> : vector<32x512xf32>
    %47 = tpu.matmul %46, %45, %cst_19 {dimension_numbers = #tpu.dot_dimension_numbers<[1], [0], [0], [1], [0, 0, 1, 1], [], []>} : vector<32x8xbf16>, vector<8x512xbf16>, vector<32x512xf32> -> vector<32x512xf32>
    %48 = arith.addf %44, %47 : vector<32x512xf32>
    %49 = vector.extract_strided_slice %24 {offsets = [0, 145], sizes = [8, 512], strides = [1, 1]} : vector<8x768xbf16> to vector<8x512xbf16>
    %50 = vector.extract_strided_slice %25 {offsets = [192, 0], sizes = [32, 8], strides = [1, 1]} : vector<288x8xbf16> to vector<32x8xbf16>
    %cst_20 = arith.constant dense<0.000000e+00> : vector<32x512xf32>
    %51 = tpu.matmul %50, %49, %cst_20 {dimension_numbers = #tpu.dot_dimension_numbers<[1], [0], [0], [1], [0, 0, 1, 1], [], []>} : vector<32x8xbf16>, vector<8x512xbf16>, vector<32x512xf32> -> vector<32x512xf32>
    %52 = arith.addf %48, %51 : vector<32x512xf32>
    %53 = vector.extract_strided_slice %24 {offsets = [0, 146], sizes = [8, 512], strides = [1, 1]} : vector<8x768xbf16> to vector<8x512xbf16>
    %54 = vector.extract_strided_slice %25 {offsets = [224, 0], sizes = [32, 8], strides = [1, 1]} : vector<288x8xbf16> to vector<32x8xbf16>
    %cst_21 = arith.constant dense<0.000000e+00> : vector<32x512xf32>
    %55 = tpu.matmul %54, %53, %cst_21 {dimension_numbers = #tpu.dot_dimension_numbers<[1], [0], [0], [1], [0, 0, 1, 1], [], []>} : vector<32x8xbf16>, vector<8x512xbf16>, vector<32x512xf32> -> vector<32x512xf32>
    %56 = arith.addf %52, %55 : vector<32x512xf32>
    %57 = vector.extract_strided_slice %24 {offsets = [0, 147], sizes = [8, 512], strides = [1, 1]} : vector<8x768xbf16> to vector<8x512xbf16>
    %58 = vector.extract_strided_slice %25 {offsets = [256, 0], sizes = [32, 8], strides = [1, 1]} : vector<288x8xbf16> to vector<32x8xbf16>
    %cst_22 = arith.constant dense<0.000000e+00> : vector<32x512xf32>
    %59 = tpu.matmul %58, %57, %cst_22 {dimension_numbers = #tpu.dot_dimension_numbers<[1], [0], [0], [1], [0, 0, 1, 1], [], []>} : vector<32x8xbf16>, vector<8x512xbf16>, vector<32x512xf32> -> vector<32x512xf32>
    %60 = arith.addf %56, %59 : vector<32x512xf32>
    %c0_23 = arith.constant 0 : index
    %c0_24 = arith.constant 0 : index
    %61 = vector.load %arg5[%c0_23, %c0_24] : memref<32x1xf32, #tpu.memory_space<vmem>>, vector<32x1xf32>
    %62 = vector.broadcast %61 : vector<32x1xf32> to vector<32x512xf32>
    %63 = arith.addf %60, %62 : vector<32x512xf32>
    %cst_25 = arith.constant 0.000000e+00 : f32
    %64 = vector.broadcast %cst_25 : f32 to vector<32x512xf32>
    %65 = arith.maximumf %63, %64 : vector<32x512xf32>
    %c0_26 = arith.constant 0 : index
    %c0_27 = arith.constant 0 : index
    %66 = vector.load %arg6[%c0_26, %c0_27] : memref<32x1xf32, #tpu.memory_space<vmem>>, vector<32x1xf32>
    %67 = vector.broadcast %66 : vector<32x1xf32> to vector<32x512xf32>
    %68 = arith.mulf %65, %67 : vector<32x512xf32>
    %cst_28 = arith.constant dense<0.000000e+00> : vector<512xf32>
    %69 = vector.multi_reduction <add>, %68, %cst_28 [0] : vector<32x512xf32> to vector<512xf32>
    %70 = vector.shape_cast %69 : vector<512xf32> to vector<1x512xf32>
    %c0_29 = arith.constant 0 : index
    %71 = memref.load %arg7[%c0_29] : memref<1xf32, #tpu.memory_space<smem>>
    %72 = vector.broadcast %71 : f32 to vector<1x512xf32>
    %73 = arith.addf %70, %72 : vector<1x512xf32>
    %c0_30 = arith.constant 0 : index
    %c0_31 = arith.constant 0 : index
    %74 = vector.load %arg8[%c0_30, %c0_31] : memref<1x512xf32, #tpu.memory_space<vmem>>, vector<1x512xf32>
    tpu.vector_store %arg8[%c0_30, %c0_31], %73 {strides = array<i32>} : memref<1x512xf32, #tpu.memory_space<vmem>>, vector<1x512xf32>,
    %c0_32 = arith.constant 0 : index
    %c0_33 = arith.constant 0 : index
    %75 = vector.load %arg3[%c0_32, %c0_33] : memref<1x512xf32, #tpu.memory_space<vmem>>, vector<1x512xf32>
    %cst_34 = arith.constant 5.000000e-01 : f32
    %76 = vector.broadcast %cst_34 : f32 to vector<1x512xf32>
    %77 = arith.cmpf ogt, %75, %76 : vector<1x512xf32>
    %c0_35 = arith.constant 0 : index
    %c0_36 = arith.constant 0 : index
    %78 = vector.load %arg2[%c0_35, %c0_36] : memref<1x512xf32, #tpu.memory_space<vmem>>, vector<1x512xf32>
    %79 = arith.subf %73, %78 : vector<1x512xf32>
    %cst_37 = arith.constant 0.000000e+00 : f32
    %80 = vector.broadcast %cst_37 : f32 to vector<1x512xf32>
    %81 = arith.select %77, %79, %80 : vector<1x512xi1>, vector<1x512xf32>
    %c0_38 = arith.constant 0 : index
    %c0_39 = arith.constant 0 : index
    %82 = vector.load %arg9[%c0_38, %c0_39] : memref<1x1xf32, #tpu.memory_space<vmem>>, vector<1x1xf32>
    %83 = arith.mulf %81, %81 : vector<1x512xf32>
    %84 = vector.shape_cast %83 : vector<1x512xf32> to vector<1x1x512xf32>
    %cst_40 = arith.constant dense<0.000000e+00> : vector<1xf32>
    %85 = vector.multi_reduction <add>, %84, %cst_40 [1, 2] : vector<1x1x512xf32> to vector<1xf32>
    %86 = vector.shape_cast %85 : vector<1xf32> to vector<1x1x1xf32>
    %87 = vector.extract %86[0, 0, 0] : f32 from vector<1x1x1xf32>
    %88 = vector.broadcast %87 : f32 to vector<1x1xf32>
    %89 = arith.addf %82, %88 : vector<1x1xf32>
    %c0_41 = arith.constant 0 : index
    %c0_42 = arith.constant 0 : index
    %90 = vector.load %arg9[%c0_41, %c0_42] : memref<1x1xf32, #tpu.memory_space<vmem>>, vector<1x1xf32>
    tpu.vector_store %arg9[%c0_41, %c0_42], %89 {strides = array<i32>} : memref<1x1xf32, #tpu.memory_space<vmem>>, vector<1x1xf32>,
    %c1_i32_43 = arith.constant 1 : i32
    %91 = arith.cmpi eq, %arg0, %c1_i32_43 : i32
    %92 = arith.extui %91 : i1 to i32
    %c0_i32_44 = arith.constant 0 : i32
    %93 = arith.cmpi ne, %92, %c0_i32_44 : i32
    scf.if %93 {
      %c0_45 = arith.constant 0 : index
      %c0_46 = arith.constant 0 : index
      %94 = vector.load %arg9[%c0_45, %c0_46] : memref<1x1xf32, #tpu.memory_space<vmem>>, vector<1x1xf32>
      %cst_47 = arith.constant 0.001953125 : f32
      %95 = vector.broadcast %cst_47 : f32 to vector<1x1xf32>
      %96 = arith.mulf %94, %95 : vector<1x1xf32>
      %c0_48 = arith.constant 0 : index
      %c0_49 = arith.constant 0 : index
      %97 = vector.load %arg9[%c0_48, %c0_49] : memref<1x1xf32, #tpu.memory_space<vmem>>, vector<1x1xf32>
      tpu.vector_store %arg9[%c0_48, %c0_49], %96 {strides = array<i32>} : memref<1x1xf32, #tpu.memory_space<vmem>>, vector<1x1xf32>,
    } else {
    }
    return
  }
  func.func @transform_1(%arg0: i32) -> (i32, i32) {
    %c0_i32 = arith.constant 0 : i32
    %c0_i32_0 = arith.constant 0 : i32
    return %c0_i32, %arg0 : i32, i32
  }
  func.func @transform_2(%arg0: i32) -> (i32, i32) {
    %c0_i32 = arith.constant 0 : i32
    %c0_i32_0 = arith.constant 0 : i32
    return %c0_i32, %arg0 : i32, i32
  }
  func.func @transform_3(%arg0: i32) -> (i32, i32) {
    %c0_i32 = arith.constant 0 : i32
    %c0_i32_0 = arith.constant 0 : i32
    %c0_i32_1 = arith.constant 0 : i32
    return %c0_i32, %c0_i32_0 : i32, i32
  }
  func.func @transform_4(%arg0: i32) -> (i32, i32) {
    %c0_i32 = arith.constant 0 : i32
    %c0_i32_0 = arith.constant 0 : i32
    %c0_i32_1 = arith.constant 0 : i32
    return %c0_i32, %c0_i32_0 : i32, i32
  }
  func.func @transform_5(%arg0: i32) -> (i32, i32) {
    %c0_i32 = arith.constant 0 : i32
    %c0_i32_0 = arith.constant 0 : i32
    %c0_i32_1 = arith.constant 0 : i32
    return %c0_i32, %c0_i32_0 : i32, i32
  }
  func.func @transform_6(%arg0: i32) -> i32 {
    %c0_i32 = arith.constant 0 : i32
    %c0_i32_0 = arith.constant 0 : i32
    return %c0_i32 : i32
  }
  func.func @transform_7(%arg0: i32) -> (i32, i32) {
    %c0_i32 = arith.constant 0 : i32
    %c0_i32_0 = arith.constant 0 : i32
    return %c0_i32, %arg0 : i32, i32
  }
  func.func @transform_8(%arg0: i32) -> (i32, i32) {
    %c0_i32 = arith.constant 0 : i32
    %c0_i32_0 = arith.constant 0 : i32
    %c0_i32_1 = arith.constant 0 : i32
    return %c0_i32, %c0_i32_0 : i32, i32
  }
}

</mosaic_0001>

<bundles_post_ra>
// kernel: tpu_custom_call.1
= control target key start
LH: loop header
LB: loop body
LE: loop exit
PB: predicated region body
PF: predicated region fallthrough
CT: control target
= control target key end

     0   :  { %s3737_s0 = inlined_call_operand.hbm [shape: bf16[8,1280], index: 0, kind: input, shape index: {}]   ;;  %s3738_s1 = inlined_call_operand.hbm [shape: f32[1,1024], index: 1, kind: input, shape index: {}]   ;;  %s3739_s2 = inlined_call_operand.hbm [shape: f32[1,1024], index: 2, kind: input, shape index: {}]   ;;  %s3740_s3 = inlined_call_operand.hbm [shape: bf16[288,8], index: 3, kind: input, shape index: {}]   ;;  %s3741_s4 = inlined_call_operand.hbm [shape: f32[32,1], index: 4, kind: input, shape index: {}]   ;;  %s3742_s5 = inlined_call_operand.hbm [shape: f32[32,1], index: 5, kind: input, shape index: {}]   ;;  %s3743_s6 = inlined_call_operand.<no memory space> [shape: f32[1], index: 6, kind: input, shape index: {}]   ;;  %s3744_s7 = inlined_call_operand.hbm [shape: f32[1,1024], index: 7, kind: output, shape index: {0}]   ;;  %s3745_s8 = inlined_call_operand.hbm [shape: f32[1,1], index: 8, kind: output, shape index: {1}]  }
   0x1   :  { %3751 = sst [smem:[#allocation31_spill]] %s3740_s3 }
   0x2   :  { %3752 = sst [smem:[#allocation32_spill]] %s3741_s4 }
   0x3   :  { %3753 = sst [smem:[#allocation33_spill]] %s3742_s5 }
   0x4   :  { %14 = sst [smem:[#allocation4]] %s3743_s6 }
   0x5   :  { %15 = vsyncpa [#allocation6], 0 }
   0x6   :  { %17 = vsyncpa [#allocation6 + $0x1], 0 }
   0x7   :  { %18 = vsyncpa [#allocation9], 0 }
   0x8   :  { %20 = vsyncpa [#allocation9 + $0x1], 0 }
   0x9   :  { %21 = vsyncpa [#allocation12], 0 }
   0xa   :  { %22 = vsyncpa [#allocation7], 0 }
   0xb   :  { %24 = vsyncpa [#allocation7 + $0x1], 0 }
   0xc   :  { %25 = vsyncpa [#allocation16], 0  ;;  %s3174_s29 = smov 0   ;;  %s3176_s30 = smov 0  }
   0xd   :  { %s3178_s9 = smov 0   ;;  %s3180_s10 = smov 0  }
   0xe LB: > { %s3195_s6 = sadd.s32 4294967295, %s3100_s10   ;;  %s2405_s11 = sadd.s32 4294967294, %s3100_s10   ;;  %s3100_s10 = sphi %s3180_s10, %s3789_s10   ;;  %s3096_s9 = sphi %s3178_s9, %s3788_s9   ;;  %s3092_s30 = sphi %s3176_s30, %s3787_s30   ;;  %s3088_s29 = sphi %s3174_s29, %s3786_s29  }
   0xf   : > { %p51_p0 = scmp.ne.s32.totalorder %s3092_s30, %s3088_s29  ;;  %p3746_p1 = scmp.eq.s32.totalorder %s3195_s6, 0 }
  0x10   : > { %p191_p3 = scmp.eq.s32.totalorder %s2405_s11, 1  ;;  %p2406_p5 = scmp.ge.s32.totalorder %s3100_s10, 1 }
  0x11   : > { %p3204_p4 = por %p3746_p1, %p51_p0  ;;  %p219_p7 = scmp.lt.s32.totalorder %s3100_s10, 3 }
  0x12   : > { %p3209_p6 = por %p191_p3, %p51_p0  ;;  %s3102_s15 = smov [#allocation10]  }
  0x13   : > { %s3754_s12 = scalar_select %p3204_p4, 1, 0 }
  0x14   : > { %s3755_s13 = scalar_select %p3209_p6, 1, 0 }
  0x15   : > { %p3215_p9 = pnand %p2406_p5, %p219_p7  ;;  %s231_s16 = sshll.u32 %s3102_s15, 4  ;;  %s3219_s16 = int_to_ptr.vmem [resolvable:$true] %s231_s16 }
  0x16   : > { %3756 = sst [smem:[#allocation30_spill]] %s3755_s13  ;;  %s3103_s18 = smov [#allocation11]  }
  0x17   : > { %s3757_s14 = scalar_select %p3215_p9, 1, 0 }
  0x18   : > { %p2684_p10 = pneg %p3215_p9  ;;  %s244_s19 = sshll.u32 %s3103_s18, 4  ;;  %s3230_s19 = int_to_ptr.vmem [resolvable:$true] %s244_s19 }
  0x19   : > { %s3759_s3 = sld [smem:[#allocation31_spill]] }
  0x1a   : > { %p3226_p12 = pnand %p2684_p10, %p3746_p1 }
  0x1c   : > { %p3240_p0 = pneg %p3226_p12 }
  0x1f   : > { %s2794_s22 = scalar_lea.hbm %s3759_s3, 2304 }
  0x20   : > { %p2795_p13 = scmp.ne.s32.totalorder %s3759_s3, %s2794_s22  ;;  %p2801_p7 = scmp.lt.u32.totalorder %s2794_s22, %s3759_s3 }
  0x22   : > { %p2797_p3 = pnand %p3240_p0, %p2795_p13 }
  0x24   : > { %p2798_p5 = pneg %p2797_p3 }
  0x26   : > { %p2803_p10 = pnand %p2801_p7, %p2798_p5 }
  0x28   : > { %2806 = shalt.err (!%p2803_p10)
}
  0x29   : > { %s2807_s28 = scalar_lea.vmem %s3219_s16, 2304  ;;  %p2815_p2 = scmp.lt.s32.totalorder %s3219_s16, %s3219_s16 }
  0x2a   : > { %p2808_p11 = scmp.ne.s32.totalorder %s3219_s16, %s2807_s28  ;;  %p2816_p6 = scmp.lt.s32.totalorder %s2807_s28, %s2807_s28 }
  0x2c   : > { %p2810_p8 = pnand %p2808_p11, %p3240_p0  ;;  %p2817_p13 = por %p2816_p6, %p2815_p2 }
  0x2e   : > { %p2811_p1 = pneg %p2810_p8 }
  0x30   : > { %p2818_p3 = pnand %p2817_p13, %p2811_p1 }
  0x32   : > { %2821 = shalt.err (!%p2818_p3)
}
  0x33   : > { %s3104_s11 = smov 64   ;;  %s3105_s15 = smov 4  }
  0x34   : > { %2687 = dma.hbm_to_vmem [thread:$0]  (!%p3226_p12), %s3759_s3, 2304, %s3219_s16, [#allocation9], %s3104_s11, %s3104_s11, %s3105_s15  }
  0x35   : > { %s3761_s4 = sld [smem:[#allocation32_spill]] }
  0x3b   : > { %s2822_s23 = scalar_lea.hbm %s3761_s4, 512 }
  0x3c   : > { %p2823_p2 = scmp.ne.s32.totalorder %s3761_s4, %s2822_s23  ;;  %p2829_p8 = scmp.lt.u32.totalorder %s2822_s23, %s3761_s4 }
  0x3e   : > { %p2825_p1 = pnand %p2823_p2, %p3240_p0 }
  0x40   : > { %p2826_p6 = pneg %p2825_p1 }
  0x42   : > { %p2831_p11 = pnand %p2829_p8, %p2826_p6 }
  0x44   : > { %2834 = shalt.err (!%p2831_p11)
}
  0x45   : > { %s2835_s16 = scalar_lea.vmem %s3230_s19, 512  ;;  %p2843_p13 = scmp.lt.s32.totalorder %s3230_s19, %s3230_s19 }
  0x46   : > { %p2836_p5 = scmp.ne.s32.totalorder %s3230_s19, %s2835_s16  ;;  %p2844_p3 = scmp.lt.s32.totalorder %s2835_s16, %s2835_s16 }
  0x48   : > { %p2838_p7 = pnand %p2836_p5, %p3240_p0  ;;  %p2845_p2 = por %p2844_p3, %p2843_p13 }
  0x4a   : > { %p2839_p10 = pneg %p2838_p7 }
  0x4c   : > { %p2846_p1 = pnand %p2845_p2, %p2839_p10 }
  0x4e   : > { %2849 = shalt.err (!%p2846_p1)
}
  0x4f   : > { %s3106_s11 = smov 128   ;;  %s3107_s15 = smov 8  }
  0x50   : > { %2690 = dma.hbm_to_vmem [thread:$0]  (!%p3226_p12), %s3761_s4, 512, %s3230_s19, [#allocation12], %s3106_s11, %s3106_s11, %s3107_s15  }
  0x51   : > { %s3108_s21 = smov [#allocation13]   ;;  %s3285_s23 = sadd.s32 1, %s3100_s10  }
  0x52   : > { %s257_s22 = sshll.u32 %s3108_s21, 4  ;;  %s3762_s5 = sld [smem:[#allocation33_spill]]  ;;  %s258_s22 = int_to_ptr.vmem [resolvable:$true] %s257_s22 }
  0x58   : > { %s2850_s27 = scalar_lea.hbm %s3762_s5, 512 }
  0x59   : > { %p2851_p6 = scmp.ne.s32.totalorder %s3762_s5, %s2850_s27  ;;  %p2857_p5 = scmp.lt.u32.totalorder %s2850_s27, %s3762_s5 }
  0x5b   : > { %p2853_p8 = pnand %p2851_p6, %p3240_p0 }
  0x5d   : > { %p2854_p11 = pneg %p2853_p8 }
  0x5f   : > { %p2859_p7 = pnand %p2857_p5, %p2854_p11 }
  0x61   : > { %2862 = shalt.err (!%p2859_p7)
}
  0x62   : > { %s2863_s19 = scalar_lea.vmem %s258_s22, 512  ;;  %p2871_p2 = scmp.lt.s32.totalorder %s258_s22, %s258_s22 }
  0x63   : > { %p2864_p10 = scmp.ne.s32.totalorder %s258_s22, %s2863_s19  ;;  %p2872_p1 = scmp.lt.s32.totalorder %s2863_s19, %s2863_s19 }
  0x65   : > { %p2866_p13 = pnand %p2864_p10, %p3240_p0  ;;  %p2873_p4 = por %p2872_p1, %p2871_p2 }
  0x67   : > { %p2867_p3 = pneg %p2866_p13 }
  0x69   : > { %p2874_p9 = pnand %p2873_p4, %p2867_p3 }
  0x6b   : > { %2877 = shalt.err (!%p2874_p9)
}
  0x6c   : > { %2693 = dma.hbm_to_vmem [thread:$0]  (!%p3226_p12), %s3762_s5, 512, %s258_s22, [#allocation12], %s3106_s11, %s3106_s11, %s3107_s15  }
  0x6d   : > { %s35_s3 = ssub.s32 %s3100_s10, %s3285_s23  ;;  %s38_s13 = sadd.s32 1, %s3096_s9 }
  0x6e   : > { %p36_p4 = scmp.eq.s32.totalorder %s35_s3, 0  ;;  %p45_p9 = scmp.ne.s32.totalorder %s3096_s9, %s3092_s30 }
  0x6f   : > { %p46_p0 = scmp.eq.s32.totalorder %s3100_s10, 0  ;;  %p2708_p6 = scmp.lt.s32.totalorder %s3100_s10, 2 }
  0x70   : > { %s3313_s17 = scalar_select %p36_p4, %s3096_s9, %s38_s13  }
  0x71   : > { %p47_p8 = por %p46_p0, %p45_p9  ;;  %p3763_p11 = scmp.eq.s32.totalorder %s3195_s6, 1 }
  0x72   : > { %s274_s21 = sand.u32 1, %s3096_s9   ;;  %s2523_s24 = sshll.u32 %s3100_s10, 6 }
  0x73   : > { %p3317_p5 = por %p3763_p11, %p45_p9  ;;  %s3323_s26 = sshll.u32 %s274_s21, 2 }
  0x74   : > { %s3328_s15 = scalar_lea.hbm %s3738_s1, %s2523_s24  ;;  %s278_s22 = scalar_lea.vmem [#allocation5], %s3323_s26 }
  0x75   : > { %s3764_s25 = scalar_select %p3317_p5, 1, 0 }
  0x76   : > { %s286_s28 = sshll.u32 %s278_s22, 4  ;;  %p3331_p12 = pnand %p2708_p6, %p47_p8  ;;  %s3335_s28 = int_to_ptr.vmem [resolvable:$true] %s286_s28 }
  0x77   : > { %s3340_s20 = scalar_lea.hbm %s3739_s2, %s2523_s24  ;;  %s275_s3 = scalar_lea.sflag [#allocation6], %s274_s21 }
  0x78   : > { %s2878_s13 = scalar_lea.hbm %s3328_s15, 64  ;;  %p2880_p10 = pneg %p3331_p12 }
  0x79   : > { %p2879_p7 = scmp.ne.s32.totalorder %s3328_s15, %s2878_s13  ;;  %s2883_s22 = scalar_lea.hbm %s3738_s1, 128 }
  0x7a   : > { %p2884_p2 = scmp.lt.u32.totalorder %s3328_s15, %s3738_s1  ;;  %p2885_p1 = scmp.lt.u32.totalorder %s2883_s22, %s2878_s13 }
  0x7b   : > { %p2881_p13 = pnand %p2880_p10, %p2879_p7  ;;  %p2887_p9 = scmp.lt.u32.totalorder %s2878_s13, %s3328_s15 }
  0x7c   : > { %p2886_p4 = por %p2885_p1, %p2884_p2 }
  0x7d   : > { %p2882_p3 = pneg %p2881_p13 }
  0x7e   : > { %p2888_p0 = por %p2887_p9, %p2886_p4 }
  0x80   : > { %p2889_p6 = pnand %p2888_p0, %p2882_p3 }
  0x82   : > { %2892 = shalt.err (!%p2889_p6)
}
  0x83   : > { %s2893_s21 = scalar_lea.vmem %s3335_s28, 64  ;;  %s3109_s24 = smov [#allocation5]  }
  0x84   : > { %p2894_p8 = scmp.ne.s32.totalorder %s3335_s28, %s2893_s21  ;;  %s2898_s19 = sshll.u32 %s3109_s24, 4  ;;  %s2899_s19 = int_to_ptr.vmem [resolvable:$false] %s2898_s19 }
  0x85   : > { %s2900_s4 = scalar_lea.vmem %s2899_s19, 128  ;;  %p2901_p13 = scmp.lt.s32.totalorder %s3335_s28, %s2899_s19 }
  0x86   : > { %p2896_p11 = pnand %p2894_p8, %p2880_p10  ;;  %p2902_p2 = scmp.lt.s32.totalorder %s2900_s4, %s2893_s21 }
  0x88   : > { %p2897_p7 = pneg %p2896_p11  ;;  %p2903_p1 = por %p2902_p2, %p2901_p13 }
  0x8a   : > { %p2904_p4 = pnand %p2903_p1, %p2897_p7 }
  0x8c   : > { %2907 = shalt.err (!%p2904_p4)
}
  0x8d   : > { %2697 = dma.hbm_to_vmem [thread:$0]  (!%p3331_p12), %s3328_s15, 64, %s3335_s28, %s275_s3  }
  0x8e   : > { %s293_s5 = sand.u32 1, %s3100_s10   ;;  %s297_s18 = scalar_lea.vmem [#allocation8], %s3323_s26 }
  0x8f   : > { %s305_s13 = sshll.u32 %s297_s18, 4  ;;  %s294_s27 = scalar_lea.sflag [#allocation9], %s293_s5  ;;  %s306_s13 = int_to_ptr.vmem [resolvable:$true] %s305_s13 }
  0x90   : > { %s2908_s11 = scalar_lea.hbm %s3340_s20, 64  ;;  %s2913_s24 = scalar_lea.hbm %s3739_s2, 128 }
  0x91   : > { %p2909_p3 = scmp.ne.s32.totalorder %s3340_s20, %s2908_s11  ;;  %p2914_p6 = scmp.lt.u32.totalorder %s3340_s20, %s3739_s2 }
  0x92   : > { %p2915_p8 = scmp.lt.u32.totalorder %s2913_s24, %s2908_s11  ;;  %p2917_p7 = scmp.lt.u32.totalorder %s2908_s11, %s3340_s20 }
  0x93   : > { %p2911_p9 = pnand %p2909_p3, %p2880_p10 }
  0x94   : > { %p2916_p11 = por %p2915_p8, %p2914_p6 }
  0x95   : > { %p2912_p0 = pneg %p2911_p9 }
  0x96   : > { %p2918_p13 = por %p2917_p7, %p2916_p11 }
  0x98   : > { %p2919_p2 = pnand %p2918_p13, %p2912_p0 }
  0x9a   : > { %2922 = shalt.err (!%p2919_p2)
}
  0x9b   : > { %s2923_s26 = scalar_lea.vmem %s306_s13, 64  ;;  %s3110_s15 = smov [#allocation8]  }
  0x9c   : > { %p2924_p1 = scmp.ne.s32.totalorder %s306_s13, %s2923_s26  ;;  %s2928_s28 = sshll.u32 %s3110_s15, 4  ;;  %s2929_s28 = int_to_ptr.vmem [resolvable:$false] %s2928_s28 }
  0x9d   : > { %s2930_s3 = scalar_lea.vmem %s2929_s28, 128  ;;  %p2931_p9 = scmp.lt.s32.totalorder %s306_s13, %s2929_s28 }
  0x9e   : > { %p2926_p4 = pnand %p2924_p1, %p2880_p10  ;;  %p2932_p5 = scmp.lt.s32.totalorder %s2930_s3, %s2923_s26 }
  0xa0   : > { %p2927_p3 = pneg %p2926_p4  ;;  %p2933_p6 = por %p2932_p5, %p2931_p9 }
  0xa2   : > { %p2934_p8 = pnand %p2933_p6, %p2927_p3 }
  0xa4   : > { %2937 = shalt.err (!%p2934_p8)
}
  0xa5   : > { %2700 = dma.hbm_to_vmem [thread:$0]  (!%p3331_p12), %s3340_s20, 64, %s306_s13, %s294_s27  }
  0xa6   : > { %p3766_p0 = scmp.ne.s32.totalorder %s3757_s14, 0 }
  0xa7   : > { %s3391_s5 = sand.u32 (!%p3766_p0), 1, %s3092_s30   ;;  %p3767_p5 = scmp.ne.s32.totalorder (!%p3766_p0), %s3754_s12, 0 }
  0xa8   : > { %314 = sbr.rel (%p3766_p0) target bundleno = 1045 (0x415), region = 44  ;;  %s3394_s18 = sshll.u32 (!%p3766_p0), %s3391_s5, 2 }
  0xa9   : > { %s317_s11 = scalar_lea.sflag (!%p3766_p0), [#allocation6], %s3391_s5  ;;  %s320_s22 = scalar_lea.vmem (!%p3766_p0), [#allocation5], %s3394_s18 }
  0xaf   : > { %3061 = dma.done.wait (%p3767_p5), %s317_s11, 64  }
  0xb0   : > { %3063 = vsyncadd (%p3767_p5), %s317_s11, 4294967232  ;;  %s325_s14 = sand.u32 1, %s3195_s6  }
  0xb1   : > { %s326_s16 = scalar_lea.sflag [#allocation9], %s325_s14 }
  0xb2   : > { %3065 = dma.done.wait (%p3767_p5), %s326_s16, 64  }
  0xb3   : > { %3067 = vsyncadd (%p3767_p5), %s326_s16, 4294967232  ;;  %p3768_p12 = scmp.eq.s32.totalorder %s3195_s6, 0 }
  0xb5   : > { %3069 = dma.done.wait (%p3768_p12), [#allocation9], 2304   ;;  %p3769_p10 = pmov %p3768_p12 }
  0xb7   : > { %3071 = vsyncadd (%p3769_p10), [#allocation9], 4294964992  ;;  %p3770_p11 = pmov %p3769_p10 }
  0xb8   : > { %p3771_p7 = pmov %p3769_p10 }
  0xb9   : > { %3073 = dma.done.wait (%p3770_p11), [#allocation12], 1024  }
  0xba   : > { %3075 = vsyncadd (%p3771_p7), [#allocation12], 4294966272  ;;  %p3772_p13 = scmp.ne.s32.totalorder %s3195_s6, 0 }
  0xbb   : > { %vm385_vm0 = vcmask (!%p3772_p13), 0   ;;  %s2425_s12 = sshll.u32 (!%p3772_p13), %s3195_s6, 9  ;;  %v3111_v0 = vmov (!%p3772_p13), 0.0   ;;  %s3112_s21 = smov (!%p3772_p13), [#allocation2]  }
  0xbc   : > { %384 = sbr.rel (%p3772_p13) target bundleno = 211 (0xd3), region = 68  ;;  %386 = vst.msk [vmem:[#allocation15] sm:$0x1] (!%p3772_p13), %vm385_vm0, %v3111_v0  ;;  %s388_s27 = sshra.s32 (!%p3772_p13), %s2425_s12, 7 }
  0xbd   : > { %s399_s24 = sshll.u32 (!%p3772_p13), %s3112_s21, 4  ;;  %s2426_s19 = sshll.u32 (!%p3772_p13), %s388_s27, 6  ;;  %s400_s24 = int_to_ptr.vmem [resolvable:$true] %s399_s24 }
  0xbe   : > { %s391_s15 = scalar_lea.hbm (!%p3772_p13), %s3737_s0, %s2426_s19  ;;  %s2940_s14 = scalar_lea.hbm (!%p3772_p13), %s3737_s0, 640 }
  0xbf   : > { %s2938_s28 = scalar_lea.hbm (!%p3772_p13), %s391_s15, 384  ;;  %p2941_p1 = scmp.lt.u32.totalorder (!%p3772_p13), %s391_s15, %s3737_s0 }
  0xc0   : > { %p2939_p2 = scmp.ne.s32.totalorder (!%p3772_p13), %s391_s15, %s2938_s28  ;;  %p2942_p4 = scmp.lt.u32.totalorder (!%p3772_p13), %s2940_s14, %s2938_s28 }
  0xc1   : > { %p2944_p9 = scmp.lt.u32.totalorder (!%p3772_p13), %s2938_s28, %s391_s15 }
  0xc2   : > { %p2943_p3 = por (!%p3772_p13), %p2942_p4, %p2941_p1 }
  0xc4   : > { %p2945_p6 = por %p2944_p9, %p2943_p3 }
  0xc6   : > { %p2946_p8 = pnand %p2945_p6, %p2939_p2 }
  0xc8   : > { %2949 = shalt.err (!%p2946_p8)  }
  0xc9   : > { %s2950_s12 = scalar_lea.vmem %s400_s24, 384  ;;  %s2954_s27 = scalar_lea.vmem %s400_s24, 768 }
  0xca   : > { %p2951_p0 = scmp.ne.s32.totalorder %s400_s24, %s2950_s12  ;;  %p2955_p5 = scmp.lt.s32.totalorder %s400_s24, %s400_s24 }
  0xcb   : > { %p2956_p12 = scmp.lt.s32.totalorder %s2954_s27, %s2950_s12 }
  0xcd   : > { %p2957_p10 = por %p2956_p12, %p2955_p5 }
  0xcf   : > { %p2958_p11 = pnand %p2957_p10, %p2951_p0 }
  0xd1   : > { %2961 = shalt.err (!%p2958_p11)  }
  0xd2   : > { %402 = dma.hbm_to_vmem [thread:$0]  %s391_s15, 384, %s400_s24, [#allocation3] }
  0xd3 PF: > { %p403_p7 = scmp.lt.s32.totalorder %s3195_s6, 0  ;;  %s404_s13 = ssub.s32 0, %s3195_s6 }
  0xd4   : > { %s2427_s21 = smin.u32 %s3195_s6, %s404_s13  ;;  %s415_s19 = sadd.s32 1, %s3195_s6 }
  0xd5   : > { %s406_s4 = sand.u32 1, %s2427_s21   ;;  %s2525_s28 = sshll.u32 %s3195_s6, 9 }
  0xd6   : > { %s407_s26 = ssub.s32 0, %s406_s4  ;;  %s2526_s11 = sadd.s32 512, %s2525_s28 }
  0xd7   : > { %s3791_s26 = smov (!%p403_p7, %s407_s26), %s406_s4  ;;  %p3436_p2 = scmp.lt.s32.totalorder %s415_s19, 2 }
  0xd8   : > { %p2429_p13 = scmp.lt.s32.totalorder %s3791_s26, 0  ;;  %s413_s3 = sadd.s32 2, %s3791_s26 }
  0xd9   : > { %s422_s15 = sshra.s32 %s2526_s11, 7 }
  0xda   : > { %s3793_s3 = smov (!%p2429_p13, %s413_s3), %s3791_s26  ;;  %s2432_s16 = sshll.u32 %s422_s15, 6 }
  0xdb   : > { %s420_s14 = ssub.s32 1, %s3793_s3  ;;  %s3444_s13 = scalar_lea.hbm %s3737_s0, %s2432_s16 }
  0xdc   : > { %s2527_s21 = smul.u32 24, %s420_s14  ;;  %s429_s28 = scalar_lea.sflag [#allocation3], %s420_s14 }
  0xdd   : > { %s2528_s4 = smul.u32 24, %s3793_s3  ;;  %s2962_s20 = scalar_lea.hbm %s3444_s13, 384 }
  0xde   : > { %s428_s26 = scalar_lea.vmem [#allocation2], %s2527_s21  ;;  %p2963_p1 = scmp.ne.s32.totalorder %s3444_s13, %s2962_s20 }
  0xdf   : > { %s437_s19 = sshll.u32 %s428_s26, 4  ;;  %s2966_s16 = scalar_lea.hbm %s3737_s0, 640  ;;  %s438_s19 = int_to_ptr.vmem [resolvable:$true] %s437_s19 }
  0xe0   : > { %p2964_p4 = pnand %p2963_p1, %p3436_p2  ;;  %p2967_p9 = scmp.lt.u32.totalorder %s3444_s13, %s3737_s0 }
  0xe1   : > { %p2968_p6 = scmp.lt.u32.totalorder %s2966_s16, %s2962_s20  ;;  %p2970_p0 = scmp.lt.u32.totalorder %s2962_s20, %s3444_s13 }
  0xe2   : > { %p2965_p3 = pneg %p2964_p4 }
  0xe3   : > { %p2969_p8 = por %p2968_p6, %p2967_p9 }
  0xe5   : > { %p2971_p5 = por %p2970_p0, %p2969_p8 }
  0xe7   : > { %p2972_p12 = pnand %p2971_p5, %p2965_p3 }
  0xe9   : > { %2975 = shalt.err (!%p2972_p12)  }
  0xea   : > { %s2976_s14 = scalar_lea.vmem %s438_s19, 384  ;;  %s3113_s21 = smov [#allocation2]  }
  0xeb   : > { %p2977_p10 = scmp.ne.s32.totalorder %s438_s19, %s2976_s14  ;;  %s2980_s26 = sshll.u32 %s3113_s21, 4  ;;  %s2981_s26 = int_to_ptr.vmem [resolvable:$false] %s2980_s26 }
  0xec   : > { %s2982_s11 = scalar_lea.vmem %s2981_s26, 768  ;;  %p2983_p13 = scmp.lt.s32.totalorder %s438_s19, %s2981_s26 }
  0xed   : > { %p2978_p11 = pnand %p2977_p10, %p3436_p2  ;;  %p2984_p1 = scmp.lt.s32.totalorder %s2982_s11, %s2976_s14 }
  0xef   : > { %p2979_p7 = pneg %p2978_p11  ;;  %p2985_p4 = por %p2984_p1, %p2983_p13 }
  0xf1   : > { %p2986_p6 = pnand %p2985_p4, %p2979_p7 }
  0xf3   : > { %2989 = shalt.err (!%p2986_p6)  }
  0xf4   : > { %2677 = dma.hbm_to_vmem [thread:$0]  (%p3436_p2), %s3444_s13, 384, %s438_s19, %s429_s28 }
  0xf5   : > { %s443_s20 = scalar_lea.vmem [#allocation2], %s2528_s4  ;;  %s444_s15 = scalar_lea.sflag [#allocation3], %s3793_s3 }
  0xf6   : > { %3076 = dma.done.wait %s444_s15, 384 }
  0xf7   : > { %3077 = vsyncadd %s444_s15, 4294966912  ;;  %v3114_v1 = vmov 0   ;;  %v450_v2 = vld [vmem:[%s443_s20 + $0x8] sm:$0xff]  ;;  %v449_v3 = vld [vmem:[%s443_s20] sm:$0xff]  ;;  %s3115_s24 = smov 18   ;;  %s3116_s3 = smov 19  }
  0xf8   : > { %578 = vmatprep.mubr.bf16.mxu0 %v3114_v1  ;;  %631 = vmatprep.mubr.bf16.mxu1 %v3114_v1  ;;  %v3471_v4 = vcombine.low %v450_v2, %v450_v2  ;;  %v2437_v5 = vcombine.low %v449_v3, %v449_v3  ;;  %v451_v6 = vld [vmem:[%s443_s20 + $0x10] sm:$0xff]  ;;  %v3474_v7 = vcombine.high %v449_v3, %v449_v3  ;;  %s3117_s13 = smov 17   ;;  %s3118_s4 = smov 1   ;;  %vm521_vm1 = vcmask 146432   ;;  %v2777_v29 = vld [vmem:[#allocation10 + $0x18] sm:$0xff]   ;;  %v2778_v38 = vld [vmem:[#allocation10] sm:$0xff]  }
  0xf9   : > { %2769 = vset.pattern.permute.xlu1 %v3114_v1  ;;  %2768 = vset.pattern.permute.xlu0 %v3114_v1  ;;  %v3476_v8 = vcombine.high %v450_v2, %v450_v2  ;;  %v3480_v9 = vcombine.low %v451_v6, %v451_v6  ;;  %s3119_s19 = smov 127   ;;  %v2482_v10 = vcombine.high %v451_v6, %v451_v6  ;;  %s3120_s28 = smov 111   ;;  %vm533_vm2 = vcmask 1043456   ;;  %v2776_v18 = vld [vmem:[#allocation10 + $0x10] sm:$0xff]   ;;  %v1944_v39 = vld [vmem:[#allocation11 + $0x8] sm:$0xff]  ;;  %v1945_v46 = vld [vmem:[#allocation11 + $0x10] sm:$0xff] }
  0xfa   : > { %515 = vrot.lane.b32.xlu1 %v3471_v4, %s3115_s24  ;;  %511 = vrot.lane.b32.xlu0 %v2437_v5, %s3115_s24  ;;  %s3121_s16 = smov 110   ;;  %s3122_s12 = smov 109   ;;  %vm526_vm3 = vcmask 64512   ;;  %vm672_vm4 = vcmask 154624   ;;  %vm821_vm5 = vcmask 138240   ;;  %v1943_v40 = vld [vmem:[#allocation11] sm:$0xff] }
  0xfb   : > { %v1946_v47 = vld [vmem:[#allocation11 + $0x18] sm:$0xff]  ;;  %v1999_v52 = vld [vmem:[#allocation13] sm:$0xff]  ;;  %v2000_v53 = vld [vmem:[#allocation13 + $0x8] sm:$0xff]  ;;  %vm986_vm6 = vcmask 7168   ;;  %vm1303_vm7 = vcmask 1039360   ;;  %vm1468_vm8 = vcmask 908288  }
  0xfc   : > { %v2779_v54 = vld [vmem:[#allocation10 + $0x8] sm:$0xff]   ;;  %v2001_v58 = vld [vmem:[#allocation13 + $0x10] sm:$0xff]  ;;  %vm1633_vm9 = vcmask 900096   ;;  %vm1798_vm10 = vcmask 891904   ;;  %s2075_s27 = sld [smem:[#allocation4]]  ;;  %s3775_s14 = scalar_lea.vmem [#allocation14], %s3394_s18 }
  0xfd   : > { %v2002_v59 = vld [vmem:[#allocation13 + $0x18] sm:$0xff]  ;;  %v2780_v0 = vld [vmem:[#allocation10 + $0x20] sm:$0xff]   ;;  %vm2196_vm13 = vcmask 1040384   ;;  %vm2215_vm14 = vcmask 0   ;;  %p2513_p2 = scmp.ne.s32.totalorder %s3195_s6, 1 }
  0xfe   : > { %517 = vrot.lane.b32.xlu1 %v3476_v8, %s3115_s24  ;;  %513 = vrot.lane.b32.xlu0 %v3474_v7, %s3115_s24  ;;  %v2781_v6 = vld [vmem:[#allocation10 + $0x28] sm:$0xff]  }
 0x102   : > { %662 = vrot.lane.b32.xlu1 %v2437_v5, %s3116_s3  ;;  %519 = vrot.lane.b32.xlu0 %v3480_v9, %s3115_s24 }
 0x106   : > { %666 = vrot.lane.b32.xlu1 %v3471_v4, %s3116_s3  ;;  %664 = vrot.lane.b32.xlu0 %v3474_v7, %s3116_s3 }
 0x10a   : > { %670 = vrot.lane.b32.xlu1 %v3480_v9, %s3116_s3  ;;  %668 = vrot.lane.b32.xlu0 %v3476_v8, %s3116_s3 }
 0x10e   : > { %811 = vrot.lane.b32.xlu0 %v2437_v5, %s3117_s13  ;;  %813 = vrot.lane.b32.xlu1 %v3474_v7, %s3117_s13 }
 0x112   : > { %815 = vrot.lane.b32.xlu0 %v3471_v4, %s3117_s13  ;;  %817 = vrot.lane.b32.xlu1 %v3476_v8, %s3117_s13 }
 0x116   : > { %819 = vrot.lane.b32.xlu0 %v3480_v9, %s3117_s13  ;;  %976 = vrot.lane.b32.xlu1 %v2437_v5, %s3118_s4 }
 0x11a   : > { %980 = vrot.lane.b32.xlu1 %v3471_v4, %s3118_s4  ;;  %978 = vrot.lane.b32.xlu0 %v3474_v7, %s3118_s4 }
 0x11e   : > { %984 = vrot.lane.b32.xlu1 %v3480_v9, %s3118_s4  ;;  %982 = vrot.lane.b32.xlu0 %v3476_v8, %s3118_s4 }
 0x122   : > { %1293 = vrot.lane.b32.xlu0 %v3474_v7, %s3119_s19  ;;  %1295 = vrot.lane.b32.xlu1 %v3471_v4, %s3119_s19 }
 0x126   : > { %1297 = vrot.lane.b32.xlu0 %v3476_v8, %s3119_s19  ;;  %1299 = vrot.lane.b32.xlu1 %v3480_v9, %s3119_s19 }
 0x12a   : > { %1301 = vrot.lane.b32.xlu0 %v2482_v10, %s3119_s19  ;;  %1458 = vrot.lane.b32.xlu1 %v3474_v7, %s3120_s28 }
 0x12e   : > { %1462 = vrot.lane.b32.xlu1 %v3476_v8, %s3120_s28  ;;  %1460 = vrot.lane.b32.xlu0 %v3471_v4, %s3120_s28 }
 0x132   : > { %1466 = vrot.lane.b32.xlu1 %v2482_v10, %s3120_s28  ;;  %1464 = vrot.lane.b32.xlu0 %v3480_v9, %s3120_s28 }
 0x136   : > { %1623 = vrot.lane.b32.xlu0 %v3474_v7, %s3121_s16  ;;  %1625 = vrot.lane.b32.xlu1 %v3471_v4, %s3121_s16 }
 0x13a   : > { %1627 = vrot.lane.b32.xlu0 %v3476_v8, %s3121_s16  ;;  %1629 = vrot.lane.b32.xlu1 %v3480_v9, %s3121_s16 }
 0x13e   : > { %1631 = vrot.lane.b32.xlu0 %v2482_v10, %s3121_s16  ;;  %1788 = vrot.lane.b32.xlu1 %v3474_v7, %s3122_s12 }
 0x142   : > { %1792 = vrot.lane.b32.xlu1 %v3476_v8, %s3122_s12  ;;  %1790 = vrot.lane.b32.xlu0 %v3471_v4, %s3122_s12 }
 0x146   : > { %1796 = vrot.lane.b32.xlu1 %v2482_v10, %s3122_s12  ;;  %1794 = vrot.lane.b32.xlu0 %v3480_v9, %s3122_s12 }
 0x14a   : > { %1954 = vperm.xlu1 %2769, %v1944_v39   ;;  %1949 = vperm.xlu0 %2768, %v1943_v40  }
 0x14e   : > { %1959 = vperm.xlu1 %2769, %v1945_v46   ;;  %1964 = vperm.xlu0 %2768, %v1946_v47   ;;  %v2788_v47 = vld [vmem:[#allocation10 + $0x60] sm:$0xff]  }
 0x152   : > { %2005 = vperm.xlu1 %2769, %v1999_v52   ;;  %2010 = vperm.xlu0 %2768, %v2000_v53  }
 0x156   : > { %2015 = vperm.xlu1 %2769, %v2001_v58   ;;  %2020 = vperm.xlu0 %2768, %v2002_v59  }
 0x16c   : > { %v516_v11 = vpop.permute.xlu1 %515  ;;  %v512_v12 = vpop.permute.xlu0 %511 }
 0x170   : > { %v518_v13 = vpop.permute.xlu1 %517  ;;  %v514_v14 = vpop.permute.xlu0 %513 }
 0x171   : > { %v523_v15 = vsel %vm521_vm1, %v514_v14, %v516_v11  ;;  %v522_v16 = vsel %vm521_vm1, %v512_v12, %v514_v14  ;;  %v524_v19 = vsel %vm521_vm1, %v516_v11, %v518_v13 }
 0x172   : > { %2442 = vmatprep.subr.msk.bf16.mxu0 %vm533_vm2, %v523_v15  ;;  %v535_v17 = vsel %vm533_vm2, %v522_v16, 0  ;;  %v541_v23 = vsel %vm533_vm2, %v524_v19, 0  ;;  %v1154_v16 = vsel %vm533_vm2, %v3476_v8, 0 }
 0x173   : > { %547 = vmatpush1.bf16.msra.mxu0 %v535_v17 }
 0x174   : > { %v663_v20 = vpop.permute.xlu1 %662  ;;  %v520_v21 = vpop.permute.xlu0 %519 }
 0x175   : > { %v525_v22 = vsel %vm521_vm1, %v518_v13, %v520_v21  ;;  %v2782_v13 = vld [vmem:[#allocation10 + $0x30] sm:$0xff]   ;;  %v2784_v21 = vld [vmem:[#allocation10 + $0x40] sm:$0xff]  }
 0x176   : > { %2443 = vmatmul.mubr.msk.bf16.vlgmr.msra.gmra.mrb[0].mxu0 %vm526_vm3, %v2776_v18  ;;  %2445 = vmatprep.subr.msk.bf16.mxu1 %vm533_vm2, %v525_v22 }
 0x177   : > { %600 = vmatpush1.bf16.msra.mxu1 %v541_v23  ;;  %588 = vmatprep.mubr.bf16.mxu0 %v3114_v1 }
 0x178   : > { %v667_v24 = vpop.permute.xlu1 %666  ;;  %v665_v25 = vpop.permute.xlu0 %664 }
 0x179   : > { %v673_v26 = vsel %vm672_vm4, %v663_v20, %v665_v25  ;;  %v674_v27 = vsel %vm672_vm4, %v665_v25, %v667_v24 }
 0x17a   : > { %v684_v28 = vsel %vm533_vm2, %v673_v26, 0  ;;  %2446 = vmatmul.mubr.msk.bf16.vlgmr.msra.gmra.mrb[0].mxu1 %vm526_vm3, %v2776_v18  ;;  %2450 = vmatprep.subr.msk.bf16.mxu0 %vm533_vm2, %v674_v27  ;;  %v2783_v18 = vld [vmem:[#allocation10 + $0x38] sm:$0xff]  }
 0x17b   : > { %696 = vmatpush1.bf16.msra.mxu0 %v684_v28  ;;  %641 = vmatprep.mubr.bf16.mxu1 %v3114_v1 }
 0x17c   : > { %v671_v30 = vpop.permute.xlu1 %670  ;;  %v669_v31 = vpop.permute.xlu0 %668 }
 0x17d   : > { %v675_v32 = vsel %vm672_vm4, %v667_v24, %v669_v31  ;;  %v676_v33 = vsel %vm672_vm4, %v669_v31, %v671_v30 }
 0x17e   : > { %v690_v34 = vsel %vm533_vm2, %v675_v32, 0  ;;  %2444 = vmatmul.mubr.msk.bf16.gmra.mrb[4].mxu0 %vm526_vm3, %v2777_v29  ;;  %2453 = vmatprep.subr.msk.bf16.mxu1 %vm533_vm2, %v676_v33 }
 0x17f   : > { %749 = vmatpush1.bf16.msra.mxu1 %v690_v34  ;;  %727 = vmatprep.mubr.bf16.mxu0 %v3114_v1  ;;  %v2786_v34 = vld [vmem:[#allocation10 + $0x50] sm:$0xff]  }
 0x180   : > { %v812_v35 = vpop.permute.xlu0 %811  ;;  %v814_v36 = vpop.permute.xlu1 %813 }
 0x181   : > { %v822_v37 = vsel %vm821_vm5, %v812_v35, %v814_v36 }
 0x182   : > { %2447 = vmatmul.mubr.msk.bf16.gmra.mrb[4].mxu1 %vm526_vm3, %v2777_v29  ;;  %v833_v41 = vsel %vm533_vm2, %v822_v37, 0  ;;  %v2785_v29 = vld [vmem:[#allocation10 + $0x48] sm:$0xff]  }
 0x183   : > { %780 = vmatprep.mubr.bf16.mxu1 %v3114_v1 }
 0x184   : > { %v816_v42 = vpop.permute.xlu0 %815  ;;  %v818_v43 = vpop.permute.xlu1 %817 }
 0x185   : > { %v823_v44 = vsel %vm821_vm5, %v814_v36, %v816_v42  ;;  %v824_v45 = vsel %vm821_vm5, %v816_v42, %v818_v43  ;;  %v2787_v42 = vld [vmem:[#allocation10 + $0x58] sm:$0xff]  }
 0x186   : > { %2451 = vmatmul.mubr.msk.bf16.vlgmr.msra.gmra.mrb[0].mxu0 %vm526_vm3, %v2778_v38  ;;  %2458 = vmatprep.subr.msk.bf16.mxu0 %vm533_vm2, %v823_v44  ;;  %v839_v48 = vsel %vm533_vm2, %v824_v45, 0 }
 0x187   : > { %845 = vmatpush1.bf16.msra.mxu0 %v833_v41  ;;  %737 = vmatprep.mubr.bf16.mxu0 %v3114_v1 }
 0x188   : > { %v820_v49 = vpop.permute.xlu0 %819  ;;  %v977_v50 = vpop.permute.xlu1 %976 }
 0x189   : > { %v825_v51 = vsel %vm821_vm5, %v818_v43, %v820_v49 }
 0x18a   : > { %2454 = vmatmul.mubr.msk.bf16.vlgmr.msra.gmra.mrb[0].mxu1 %vm526_vm3, %v2778_v38  ;;  %2461 = vmatprep.subr.msk.bf16.mxu1 %vm533_vm2, %v825_v51 }
 0x18b   : > { %898 = vmatpush1.bf16.msra.mxu1 %v839_v48  ;;  %790 = vmatprep.mubr.bf16.mxu1 %v3114_v1 }
 0x18c   : > { %v981_v55 = vpop.permute.xlu1 %980  ;;  %v979_v56 = vpop.permute.xlu0 %978 }
 0x18d   : > { %v988_v57 = vsel %vm986_vm6, %v979_v56, %v981_v55  ;;  %v987_v62 = vsel %vm986_vm6, %v977_v50, %v979_v56 }
 0x18e   : > { %2452 = vmatmul.mubr.msk.bf16.gmra.mrb[4].mxu0 %vm526_vm3, %v2779_v54  ;;  %2466 = vmatprep.subr.msk.bf16.mxu0 %vm533_vm2, %v988_v57  ;;  %v998_v2 = vsel %vm533_vm2, %v987_v62, 0  ;;  %v2790_v57 = vld [vmem:[#allocation10 + $0x70] sm:$0xff]   ;;  %v2792_v62 = vld [vmem:[#allocation10 + $0x80] sm:$0xff]  }
 0x18f   : > { %876 = vmatprep.mubr.bf16.mxu0 %v3114_v1 }
 0x190   : > { %v985_v60 = vpop.permute.xlu1 %984  ;;  %v983_v61 = vpop.permute.xlu0 %982 }
 0x191   : > { %v990_v63 = vsel %vm986_vm6, %v983_v61, %v985_v60  ;;  %v989_v3 = vsel %vm986_vm6, %v981_v55, %v983_v61  ;;  %v2789_v55 = vld [vmem:[#allocation10 + $0x68] sm:$0xff]   ;;  %v2791_v61 = vld [vmem:[#allocation10 + $0x78] sm:$0xff]  }
 0x192   : > { %2455 = vmatmul.mubr.msk.bf16.gmra.mrb[4].mxu1 %vm526_vm3, %v2779_v54  ;;  %2469 = vmatprep.subr.msk.bf16.mxu1 %vm533_vm2, %v990_v63  ;;  %v1004_v5 = vsel %vm533_vm2, %v989_v3, 0  ;;  %v2793_v63 = vld [vmem:[#allocation10 + $0x88] sm:$0xff]  }
 0x193   : > { %929 = vmatprep.mubr.bf16.mxu1 %v3114_v1 }
 0x194   : > { %v1294_v10 = vpop.permute.xlu0 %1293  ;;  %v1296_v11 = vpop.permute.xlu1 %1295 }
 0x195   : > { %v1304_v8 = vsel %vm1303_vm7, %v1294_v10, %v1296_v11 }
 0x196   : > { %2459 = vmatmul.mubr.msk.bf16.vlgmr.msra.gmra.mrb[0].mxu0 %vm526_vm3, %v2780_v0  ;;  %v1315_v22 = vsel %vm533_vm2, %v1304_v8, 0 }
 0x197   : > { %1010 = vmatpush1.bf16.msra.mxu0 %v998_v2  ;;  %886 = vmatprep.mubr.bf16.mxu0 %v3114_v1 }
 0x198   : > { %2474 = vmatprep.subr.msk.bf16.mxu0 %vm533_vm2, %v3471_v4  ;;  %v1298_v12 = vpop.permute.xlu0 %1297  ;;  %v1148_v4 = vsel %vm533_vm2, %v3474_v7, 0 }
 0x199   : > { %v1305_v14 = vsel %vm1303_vm7, %v1296_v11, %v1298_v12 }
 0x19a   : > { %2462 = vmatmul.mubr.msk.bf16.vlgmr.msra.gmra.mrb[0].mxu1 %vm526_vm3, %v2780_v0 }
 0x19b   : > { %1063 = vmatpush1.bf16.msra.mxu1 %v1004_v5  ;;  %939 = vmatprep.mubr.bf16.mxu1 %v3114_v1 }
 0x19c   : > { %2477 = vmatprep.subr.msk.bf16.mxu1 %vm533_vm2, %v3480_v9  ;;  %v1300_v9 = vpop.permute.xlu1 %1299  ;;  %v1302_v15 = vpop.permute.xlu0 %1301 }
 0x19d   : > { %v1307_v17 = vsel %vm1303_vm7, %v1300_v9, %v1302_v15  ;;  %v1306_v23 = vsel %vm1303_vm7, %v1298_v12, %v1300_v9 }
 0x19e   : > { %2460 = vmatmul.mubr.msk.bf16.gmra.mrb[4].mxu0 %vm526_vm3, %v2781_v6  ;;  %v1321_v27 = vsel %vm533_vm2, %v1306_v23, 0 }
 0x19f   : > { %1041 = vmatprep.mubr.bf16.mxu0 %v3114_v1 }
 0x1a0   : > { %v1459_v7 = vpop.permute.xlu1 %1458  ;;  %v1461_v20 = vpop.permute.xlu0 %1460 }
 0x1a1   : > { %v1469_v33 = vsel %vm1468_vm8, %v1459_v7, %v1461_v20 }
 0x1a2   : > { %2463 = vmatmul.mubr.msk.bf16.gmra.mrb[4].mxu1 %vm526_vm3, %v2781_v6  ;;  %v1480_v35 = vsel %vm533_vm2, %v1469_v33, 0 }
 0x1a3   : > { %1094 = vmatprep.mubr.bf16.mxu1 %v3114_v1 }
 0x1a4   : > { %v1463_v19 = vpop.permute.xlu1 %1462  ;;  %v1465_v26 = vpop.permute.xlu0 %1464 }
 0x1a5   : > { %v1470_v24 = vsel %vm1468_vm8, %v1461_v20, %v1463_v19  ;;  %v1471_v36 = vsel %vm1468_vm8, %v1463_v19, %v1465_v26 }
 0x1a6   : > { %2467 = vmatmul.mubr.msk.bf16.vlgmr.msra.gmra.mrb[0].mxu0 %vm526_vm3, %v2782_v13  ;;  %v1486_v40 = vsel %vm533_vm2, %v1471_v36, 0 }
 0x1a7   : > { %1051 = vmatprep.mubr.bf16.mxu0 %v3114_v1  ;;  %1160 = vmatpush1.bf16.msra.mxu0 %v1148_v4 }
 0x1a8   : > { %2483 = vmatprep.subr.msk.bf16.mxu0 %vm533_vm2, %v1305_v14  ;;  %v1467_v25 = vpop.permute.xlu1 %1466  ;;  %v1624_v30 = vpop.permute.xlu0 %1623 }
 0x1a9   : > { %v1472_v28 = vsel %vm1468_vm8, %v1465_v26, %v1467_v25 }
 0x1aa   : > { %2470 = vmatmul.mubr.msk.bf16.vlgmr.msra.gmra.mrb[0].mxu1 %vm526_vm3, %v2782_v13 }
 0x1ab   : > { %1213 = vmatpush1.bf16.msra.mxu1 %v1154_v16  ;;  %1104 = vmatprep.mubr.bf16.mxu1 %v3114_v1 }
 0x1ac   : > { %2486 = vmatprep.subr.msk.bf16.mxu1 %vm533_vm2, %v1307_v17  ;;  %v1626_v31 = vpop.permute.xlu1 %1625  ;;  %v1628_v32 = vpop.permute.xlu0 %1627 }
 0x1ad   : > { %v1635_v37 = vsel %vm1633_vm9, %v1626_v31, %v1628_v32  ;;  %v1634_v46 = vsel %vm1633_vm9, %v1624_v30, %v1626_v31 }
 0x1ae   : > { %2468 = vmatmul.mubr.msk.bf16.gmra.mrb[4].mxu0 %vm526_vm3, %v2783_v18  ;;  %v1645_v48 = vsel %vm533_vm2, %v1634_v46, 0 }
 0x1af   : > { %1191 = vmatprep.mubr.bf16.mxu0 %v3114_v1 }
 0x1b0   : > { %v1630_v38 = vpop.permute.xlu1 %1629  ;;  %v1632_v39 = vpop.permute.xlu0 %1631 }
 0x1b1   : > { %v1637_v41 = vsel %vm1633_vm9, %v1630_v38, %v1632_v39  ;;  %v1636_v49 = vsel %vm1633_vm9, %v1628_v32, %v1630_v38 }
 0x1b2   : > { %2471 = vmatmul.mubr.msk.bf16.gmra.mrb[4].mxu1 %vm526_vm3, %v2783_v18  ;;  %v1651_v53 = vsel %vm533_vm2, %v1636_v49, 0 }
 0x1b3   : > { %1244 = vmatprep.mubr.bf16.mxu1 %v3114_v1 }
 0x1b4   : > { %v1789_v43 = vpop.permute.xlu1 %1788  ;;  %v1791_v45 = vpop.permute.xlu0 %1790 }
 0x1b5   : > { %v1799_v56 = vsel %vm1798_vm10, %v1789_v43, %v1791_v45 }
 0x1b6   : > { %2475 = vmatmul.mubr.msk.bf16.vlgmr.msra.gmra.mrb[0].mxu0 %vm526_vm3, %v2784_v21  ;;  %v1810_v58 = vsel %vm533_vm2, %v1799_v56, 0 }
 0x1b7   : > { %1327 = vmatpush1.bf16.msra.mxu0 %v1315_v22  ;;  %1201 = vmatprep.mubr.bf16.mxu0 %v3114_v1 }
 0x1b8   : > { %2491 = vmatprep.subr.msk.bf16.mxu0 %vm533_vm2, %v1470_v24  ;;  %v1793_v44 = vpop.permute.xlu1 %1792  ;;  %v1795_v52 = vpop.permute.xlu0 %1794 }
 0x1b9   : > { %v1800_v50 = vsel %vm1798_vm10, %v1791_v45, %v1793_v44  ;;  %v1801_v59 = vsel %vm1798_vm10, %v1793_v44, %v1795_v52 }
 0x1ba   : > { %2478 = vmatmul.mubr.msk.bf16.vlgmr.msra.gmra.mrb[0].mxu1 %vm526_vm3, %v2784_v21  ;;  %v1816_v60 = vsel %vm533_vm2, %v1801_v59, 0 }
 0x1bb   : > { %1380 = vmatpush1.bf16.msra.mxu1 %v1321_v27  ;;  %1254 = vmatprep.mubr.bf16.mxu1 %v3114_v1 }
 0x1bc   : > { %2494 = vmatprep.subr.msk.bf16.mxu1 %vm533_vm2, %v1472_v28  ;;  %v1797_v51 = vpop.permute.xlu1 %1796 }
 0x1bd   : > { %v1802_v54 = vsel %vm1798_vm10, %v1795_v52, %v1797_v51 }
 0x1be   : > { %2476 = vmatmul.mubr.msk.bf16.gmra.mrb[4].mxu0 %vm526_vm3, %v2785_v29 }
 0x1bf   : > { %1358 = vmatprep.mubr.bf16.mxu0 %v3114_v1 }
 0x1c2   : > { %2479 = vmatmul.mubr.msk.bf16.gmra.mrb[4].mxu1 %vm526_vm3, %v2785_v29 }
 0x1c3   : > { %1411 = vmatprep.mubr.bf16.mxu1 %v3114_v1 }
 0x1c6   : > { %2484 = vmatmul.mubr.msk.bf16.vlgmr.msra.gmra.mrb[0].mxu0 %vm526_vm3, %v2786_v34 }
 0x1c7   : > { %1492 = vmatpush1.bf16.msra.mxu0 %v1480_v35  ;;  %1368 = vmatprep.mubr.bf16.mxu0 %v3114_v1 }
 0x1c8   : > { %2499 = vmatprep.subr.msk.bf16.mxu0 %vm533_vm2, %v1635_v37 }
 0x1c9   : > { %v1955_v0 = vpop.permute.xlu1 %1954  ;;  %v1950_v2 = vpop.permute.xlu0 %1949 }
 0x1ca   : > { %2487 = vmatmul.mubr.msk.bf16.vlgmr.msra.gmra.mrb[0].mxu1 %vm526_vm3, %v2786_v34 }
 0x1cb   : > { %1545 = vmatpush1.bf16.msra.mxu1 %v1486_v40  ;;  %1421 = vmatprep.mubr.bf16.mxu1 %v3114_v1 }
 0x1cc   : > { %2502 = vmatprep.subr.msk.bf16.mxu1 %vm533_vm2, %v1637_v41 }
 0x1cd   : > { %v1960_v3 = vpop.permute.xlu1 %1959  ;;  %v3649_v6 = vpop.permute.xlu0 %1964 }
 0x1ce   : > { %2485 = vmatmul.mubr.msk.bf16.gmra.mrb[4].mxu0 %vm526_vm3, %v2787_v42 }
 0x1cf   : > { %1523 = vmatprep.mubr.bf16.mxu0 %v3114_v1 }
 0x1d1   : > { %v2006_v18 = vpop.permute.xlu1 %2005  ;;  %v2011_v22 = vpop.permute.xlu0 %2010 }
 0x1d2   : > { %2488 = vmatmul.mubr.msk.bf16.gmra.mrb[4].mxu1 %vm526_vm3, %v2787_v42 }
 0x1d3   : > { %1576 = vmatprep.mubr.bf16.mxu1 %v3114_v1 }
 0x1d5   : > { %v2016_v49 = vpop.permute.xlu1 %2015 }
 0x1d6   : > { %2492 = vmatmul.mubr.msk.bf16.vlgmr.msra.gmra.mrb[0].mxu0 %vm526_vm3, %v2788_v47 }
 0x1d7   : > { %1657 = vmatpush1.bf16.msra.mxu0 %v1645_v48  ;;  %1533 = vmatprep.mubr.bf16.mxu0 %v3114_v1 }
 0x1d8   : > { %2507 = vmatprep.subr.msk.bf16.mxu0 %vm533_vm2, %v1800_v50 }
 0x1da   : > { %2495 = vmatmul.mubr.msk.bf16.vlgmr.msra.gmra.mrb[0].mxu1 %vm526_vm3, %v2788_v47 }
 0x1db   : > { %1710 = vmatpush1.bf16.msra.mxu1 %v1651_v53  ;;  %1586 = vmatprep.mubr.bf16.mxu1 %v3114_v1 }
 0x1dc   : > { %2510 = vmatprep.subr.msk.bf16.mxu1 %vm533_vm2, %v1802_v54 }
 0x1de   : > { %2493 = vmatmul.mubr.msk.bf16.gmra.mrb[4].mxu0 %vm526_vm3, %v2789_v55 }
 0x1df   : > { %1688 = vmatprep.mubr.bf16.mxu0 %v3114_v1 }
 0x1e2   : > { %2496 = vmatmul.mubr.msk.bf16.gmra.mrb[4].mxu1 %vm526_vm3, %v2789_v55 }
 0x1e3   : > { %1741 = vmatprep.mubr.bf16.mxu1 %v3114_v1 }
 0x1e6   : > { %2500 = vmatmul.mubr.msk.bf16.vlgmr.msra.gmra.mrb[0].mxu0 %vm526_vm3, %v2790_v57 }
 0x1e7   : > { %1822 = vmatpush1.bf16.msra.mxu0 %v1810_v58  ;;  %1698 = vmatprep.mubr.bf16.mxu0 %v3114_v1 }
 0x1ea   : > { %2503 = vmatmul.mubr.msk.bf16.vlgmr.msra.gmra.mrb[0].mxu1 %vm526_vm3, %v2790_v57 }
 0x1eb   : > { %1875 = vmatpush1.bf16.msra.mxu1 %v1816_v60  ;;  %1751 = vmatprep.mubr.bf16.mxu1 %v3114_v1  ;;  %v2021_v60 = vpop.permute.xlu0 %2020 }
 0x1ee   : > { %2501 = vmatmul.mubr.msk.bf16.gmra.mrb[4].mxu0 %vm526_vm3, %v2791_v61 }
 0x1ef   : > { %1853 = vmatprep.mubr.bf16.mxu0 %v3114_v1 }
 0x1f2   : > { %2504 = vmatmul.mubr.msk.bf16.gmra.mrb[4].mxu1 %vm526_vm3, %v2791_v61 }
 0x1f3   : > { %1906 = vmatprep.mubr.bf16.mxu1 %v3114_v1 }
 0x1f6   : > { %2508 = vmatmul.mubr.msk.bf16.vlgmr.msra.gmra.mrb[0].mxu0 %vm526_vm3, %v2792_v62 }
 0x1f7   : > { %1863 = vmatprep.mubr.bf16.mxu0 %v3114_v1 }
 0x1fa   : > { %2511 = vmatmul.mubr.msk.bf16.vlgmr.msra.gmra.mrb[0].mxu1 %vm526_vm3, %v2792_v62 }
 0x1fb   : > { %1916 = vmatprep.mubr.bf16.mxu1 %v3114_v1 }
 0x1fe   : > { %2509 = vmatmul.mubr.msk.bf16.gmra.mrb[4].mxu0 %vm526_vm3, %v2793_v63 }
 0x202   : > { %2512 = vmatmul.mubr.msk.bf16.gmra.mrb[4].mxu1 %vm526_vm3, %v2793_v63 }
 0x2c9   : > { %v1855_v5 = vpop.f32.mrb[0].mxu0 }
 0x2ca   : > { %v1967_v10 = vadd.f32 %v1950_v2, %v1855_v5  ;;  %v1857_v11 = vpop.f32.mrb[1].mxu0 }
 0x2cb   : > { %v1968_v12 = vadd.f32 %v1950_v2, %v1857_v11  ;;  %v1859_v13 = vpop.f32.mrb[2].mxu0 }
 0x2cc   : > { %v1983_v4 = vmax.f32 %v1967_v10, 0.0  ;;  %v1971_v14 = vadd.f32 %v1955_v0, %v1859_v13  ;;  %v1861_v9 = vpop.f32.mrb[3].mxu0 }
 0x2cd   : > { %v1984_v15 = vmax.f32 %v1968_v12, 0.0  ;;  %v1972_v16 = vadd.f32 %v1955_v0, %v1861_v9  ;;  %v1908_v1 = vpop.f32.mrb[0].mxu1  ;;  %v2090_v9 = vlaneseq }
 0x2ce   : > { %v1987_v17 = vmax.f32 %v1971_v14, 0.0  ;;  %v1969_v7 = vadd.f32 %v1950_v2, %v1908_v1  ;;  %v1910_v19 = vpop.f32.mrb[1].mxu1  ;;  %v2023_v23 = vmul.f32 %v2006_v18, %v1983_v4 }
 0x2cf   : > { %v1988_v20 = vmax.f32 %v1972_v16, 0.0  ;;  %v1970_v8 = vadd.f32 %v1950_v2, %v1910_v19  ;;  %v1912_v21 = vpop.f32.mrb[2].mxu1  ;;  %v2024_v28 = vmul.f32 %v2006_v18, %v1984_v15  ;;  %vm2112_vm11 = vcmp.lt.s32.totalorder %v2090_v9, 512 }
 0x2d0   : > { %v1985_v24 = vmax.f32 %v1969_v7, 0.0  ;;  %v1973_v25 = vadd.f32 %v1955_v0, %v1912_v21  ;;  %v2027_v26 = vmul.f32 %v2011_v22, %v1987_v17  ;;  %v1914_v27 = vpop.f32.mrb[3].mxu1 }
 0x2d1   : > { %v1986_v29 = vmax.f32 %v1970_v8, 0.0  ;;  %v2028_v30 = vmul.f32 %v2011_v22, %v1988_v20  ;;  %v1974_v31 = vadd.f32 %v1955_v0, %v1914_v27  ;;  %v1865_v32 = vpop.f32.mrb[4].mxu0 }
 0x2d2   : > { %v1989_v33 = vmax.f32 %v1973_v25, 0.0  ;;  %v2039_v34 = vadd.f32 %v2027_v26, %v2023_v23  ;;  %v1975_v35 = vadd.f32 %v1960_v3, %v1865_v32  ;;  %v1867_v36 = vpop.f32.mrb[5].mxu0  ;;  %v2025_v41 = vmul.f32 %v2006_v18, %v1985_v24 }
 0x2d3   : > { %v2048_v37 = vadd.f32 %v2028_v30, %v2024_v28  ;;  %v1990_v38 = vmax.f32 %v1974_v31, 0.0  ;;  %v1976_v39 = vadd.f32 %v1960_v3, %v1867_v36  ;;  %v1869_v40 = vpop.f32.mrb[6].mxu0  ;;  %v2026_v46 = vmul.f32 %v2006_v18, %v1986_v29 }
 0x2d4   : > { %v2029_v42 = vmul.f32 %v2011_v22, %v1989_v33  ;;  %v1991_v43 = vmax.f32 %v1975_v35, 0.0  ;;  %v1979_v44 = vadd.f32 %v3649_v6, %v1869_v40  ;;  %v1871_v45 = vpop.f32.mrb[7].mxu0  ;;  %v2117_v35 = vld [vmem:[%s320_s22] sm:$0xf]  ;;  %v3123_v40 = vmov 1966171168  }
 0x2d5   : > { %v2030_v47 = vmul.f32 %v2011_v22, %v1990_v38  ;;  %v1992_v48 = vmax.f32 %v1976_v39, 0.0  ;;  %v1980_v50 = vadd.f32 %v3649_v6, %v1871_v45  ;;  %v1918_v51 = vpop.f32.mrb[4].mxu1  ;;  %v3656_v22 = vshrl.u32 %v2090_v9, 7  ;;  %s3774_s22 = scalar_lea.vmem [#allocation8], %s3394_s18 }
 0x2d6   : > { %v2031_v52 = vmul.f32 %v2016_v49, %v1991_v43  ;;  %v1995_v53 = vmax.f32 %v1979_v44, 0.0  ;;  %v1977_v54 = vadd.f32 %v1960_v3, %v1918_v51  ;;  %v2057_v55 = vadd.f32 %v2029_v42, %v2025_v41  ;;  %v1920_v56 = vpop.f32.mrb[5].mxu1 }
 0x2d7   : > { %v2066_v57 = vadd.f32 %v2030_v47, %v2026_v46  ;;  %v2032_v58 = vmul.f32 %v2016_v49, %v1992_v48  ;;  %v1996_v59 = vmax.f32 %v1980_v50, 0.0  ;;  %v1978_v61 = vadd.f32 %v1960_v3, %v1920_v56  ;;  %v1922_v62 = vpop.f32.mrb[6].mxu1 }
 0x2d8   : > { %v1993_v63 = vmax.f32 %v1977_v54, 0.0  ;;  %v2040_v0 = vadd.f32 %v2039_v34, %v2031_v52  ;;  %v2035_v2 = vmul.f32 %v2021_v60, %v1995_v53  ;;  %v1981_v5 = vadd.f32 %v3649_v6, %v1922_v62  ;;  %v1924_v10 = vpop.f32.mrb[7].mxu1 }
 0x2d9   : > { %v2049_v11 = vadd.f32 %v2048_v37, %v2032_v58  ;;  %v2036_v12 = vmul.f32 %v2021_v60, %v1996_v59  ;;  %v1994_v13 = vmax.f32 %v1978_v61, 0.0  ;;  %v1982_v4 = vadd.f32 %v3649_v6, %v1924_v10 }
 0x2da   : > { %v2033_v14 = vmul.f32 %v2016_v49, %v1993_v63  ;;  %v2041_v15 = vadd.f32 %v2040_v0, %v2035_v2  ;;  %v1997_v16 = vmax.f32 %v1981_v5, 0.0  ;;  %v2121_v32 = vsub.s32 0, %v3656_v22 }
 0x2db   : > { %v2050_v1 = vadd.f32 %v2049_v11, %v2036_v12  ;;  %v2034_v17 = vmul.f32 %v2016_v49, %v1994_v13  ;;  %v1998_v18 = vmax.f32 %v1982_v4, 0.0  ;;  %v2125_v36 = vsub.s32 1, %v3656_v22 }
 0x2dc   : > { %v2058_v3 = vadd.f32 %v2057_v55, %v2033_v14  ;;  %v2042_v7 = vrot.slane %v2041_v15, 4  ;;  %v2037_v19 = vmul.f32 %v2021_v60, %v1997_v16  ;;  %v2076_v39 = vstv %s2075_s27  ;;  %v2115_v16 = vld [vmem:[%s3774_s22] sm:$0xf] }
 0x2dd   : > { %v2051_v20 = vrot.slane %v2050_v1, 4  ;;  %v2067_v8 = vadd.f32 %v2066_v57, %v2034_v17  ;;  %v2038_v21 = vmul.f32 %v2021_v60, %v1998_v18  ;;  %v2088_v41 = vunpack.c.l.s4 %v3123_v40 }
 0x2de   : > { %v2043_v23 = vadd.f32 %v2042_v7, %v2041_v15  ;;  %v2059_v6 = vadd.f32 %v2058_v3, %v2037_v19  ;;  %v2122_v46 = vrot.slane %v2117_v35, %v2121_v32  ;;  %v2129_v47 = vsub.s32 2, %v3656_v22 }
 0x2df   : > { %v2052_v24 = vadd.f32 %v2051_v20, %v2050_v1  ;;  %v2068_v25 = vadd.f32 %v2067_v8, %v2038_v21  ;;  %v2126_v50 = vrot.slane %v2117_v35, %v2125_v36  ;;  %v2133_v51 = vsub.s32 3, %v3656_v22 }
 0x2e0   : > { %v2044_v26 = vrot.slane %v2043_v23, 2  ;;  %v2060_v27 = vrot.slane %v2059_v6, 4  ;;  %v2089_v54 = vunpack.c.0.s8 %v2088_v41  ;;  %v2130_v58 = vrot.slane %v2117_v35, %v2129_v47 }
 0x2e1   : > { %v2053_v28 = vrot.slane %v2052_v24, 2  ;;  %v2069_v29 = vrot.slane %v2068_v25, 4  ;;  %v2134_v62 = vrot.slane %v2117_v35, %v2133_v51  ;;  %vm2116_vm12 = vcmp.gt.f32.partialorder %v2115_v16, 0.5 }
 0x2e2   : > { %v2045_v30 = vadd.f32 %v2044_v26, %v2043_v23  ;;  %v2061_v31 = vadd.f32 %v2060_v27, %v2059_v6  ;;  %v2092_v2 = vsub.s32 %v2089_v54, %v3656_v22 }
 0x2e3   : > { %v2054_v33 = vadd.f32 %v2053_v28, %v2052_v24  ;;  %v2070_v34 = vadd.f32 %v2069_v29, %v2068_v25 }
 0x2e4   : > { %v2046_v37 = vrot.slane %v2045_v30, 1  ;;  %v2062_v38 = vrot.slane %v2061_v31, 2 }
 0x2e5   : > { %v2055_v42 = vrot.slane %v2054_v33, 1  ;;  %v2071_v43 = vrot.slane %v2070_v34, 2 }
 0x2e6   : > { %v2047_v44 = vadd.f32 %v2046_v37, %v2045_v30  ;;  %v2063_v45 = vadd.f32 %v2062_v38, %v2061_v31 }
 0x2e7   : > { %v2056_v48 = vadd.f32 %v2055_v42, %v2054_v33  ;;  %v2072_v49 = vadd.f32 %v2071_v43, %v2070_v34 }
 0x2e8   : > { %v2077_v52 = vadd.f32 %v2076_v39, %v2047_v44  ;;  %v2064_v53 = vrot.slane %v2063_v45, 1 }
 0x2e9   : > { %v2078_v55 = vadd.f32 %v2076_v39, %v2056_v48  ;;  %v2073_v56 = vrot.slane %v2072_v49, 1 }
 0x2ea   : > { %v2065_v57 = vadd.f32 %v2064_v53, %v2063_v45  ;;  %v2139_v59 = vsub.f32 %v2077_v52, %v2122_v46 }
 0x2eb   : > { %v2085_v60 = vcombine.low %v2077_v52, %v2078_v55  ;;  %v2074_v61 = vadd.f32 %v2073_v56, %v2072_v49  ;;  %v2140_v63 = vsub.f32 %v2078_v55, %v2126_v50 }
 0x2ec   : > { %v2079_v0 = vadd.f32 %v2076_v39, %v2065_v57 }
 0x2ed   : > { %v2080_v5 = vadd.f32 %v2076_v39, %v2074_v61  ;;  %v2147_v10 = vcombine.low %v2139_v59, %v2140_v63  ;;  %v2093_v4 = vrot.slane %v2085_v60, %v2092_v2 }
 0x2ee   : > { %v2141_v11 = vsub.f32 %v2079_v0, %v2130_v58 }
 0x2ef   : > { %v2086_v12 = vcombine.low %v2079_v0, %v2080_v5  ;;  %v2142_v13 = vsub.f32 %v2080_v5, %v2134_v62  ;;  %v2155_v1 = vrot.slane %v2147_v10, %v2092_v2 }
 0x2f1   : > { %v2100_v14 = vrot.slane %v2086_v12, %v2092_v2  ;;  %v2148_v15 = vcombine.low %v2141_v11, %v2142_v13 }
 0x2f3   : > { %v2162_v17 = vrot.slane %v2148_v15, %v2092_v2  ;;  %v2101_v18 = vcombine.low %v2093_v4, %v2100_v14 }
 0x2f5   : > { %v2163_v3 = vcombine.low %v2155_v1, %v2162_v17  ;;  %v2108_v7 = vrot.slane %v2101_v18, %v2092_v2 }
 0x2f7   : > { %v2170_v19 = vrot.slane %v2163_v3, %v2092_v2  ;;  %2114 = vst.msk [vmem:[%s3775_s14] sm:$0xf] %vm2112_vm11, %v2108_v7 }
 0x2f9   : > { %v2172_v20 = vsel %vm2116_vm12, %v2170_v19, 0.0 }
 0x2fa   : > { %v2174_v8 = vmul.f32 %v2172_v20, %v2172_v20 }
 0x2fc   : > { %v2179_v21 = vrot.slane %v2174_v8, %v2121_v32  ;;  %v2183_v22 = vrot.slane %v2174_v8, %v2125_v36  ;;  %v2187_v23 = vrot.slane %v2174_v8, %v2129_v47  ;;  %v2191_v6 = vrot.slane %v2174_v8, %v2133_v51  ;;  %v2173_v32 = vld [vmem:[#allocation15] sm:$0x1] }
 0x2fe   : > { %v2197_v24 = vsel %vm2196_vm13, %v2179_v21, 0.0  ;;  %v2198_v25 = vsel %vm2196_vm13, %v2183_v22, 0.0  ;;  %v2200_v27 = vsel %vm2196_vm13, %v2187_v23, 0.0  ;;  %v2202_v29 = vsel %vm2196_vm13, %v2191_v6, 0.0 }
 0x2ff   : > { %v2199_v26 = vadd.f32 %v2198_v25, %v2197_v24 }
 0x301   : > { %v2201_v28 = vadd.f32 %v2200_v27, %v2199_v26 }
 0x303   : > { %v2203_v9 = vadd.f32 %v2202_v29, %v2201_v28 }
 0x305   : > { %2204 = vadd.xlane.f32.xlu1 %v2203_v9 }
 0x392   : > { %v2205_v30 = vpop.xlane.xlu1 %2204 }
 0x393   : > { %v2206_v31 = vrot.slane %v2205_v30, 4 }
 0x395   : > { %v2207_v33 = vadd.f32 %v2206_v31, %v2205_v30 }
 0x397   : > { %v2208_v34 = vrot.slane %v2207_v33, 2 }
 0x399   : > { %v2209_v35 = vadd.f32 %v2208_v34, %v2207_v33 }
 0x39b   : > { %v2210_v37 = vrot.slane %v2209_v35, 1 }
 0x39d   : > { %v2211_v38 = vadd.f32 %v2210_v37, %v2209_v35 }
 0x39f   : > { %2658 = vpush %v2211_v38 }
 0x3ce   : > { %2220 = sbr.rel (%p2513_p2) target bundleno = 991 (0x3df), region = 84 }
 0x3d0   : > { %s2659_s21 = spop %2658 }
 0x3d1   : > { %v2213_v36 = vstv %s2659_s21 }
 0x3d2   : > { %v2214_v39 = vadd.f32 %v2213_v36, %v2173_v32 }
 0x3d4   : > { %2216 = vst.msk [vmem:[#allocation15] sm:$0x1] %vm2215_vm14, %v2214_v39 }
 0x3db   : > { %v2221_v40 = vld [vmem:[#allocation15] sm:$0x1] }
 0x3dc   : > { %v2222_v41 = vmul.f32 0.001953125, %v2221_v40 }
 0x3de   : > { %2223 = vst.msk [vmem:[#allocation15] sm:$0x1] %vm2215_vm14, %v2222_v41 }
 0x3df PF: > { %s2529_s26 = sshll.u32 %s3195_s6, 6  ;;  %s3776_s24 = scalar_lea.vmem [#allocation14], %s3394_s18 }
 0x3e0   : > { %s3675_s15 = scalar_lea.hbm %s3744_s7, %s2529_s26  ;;  %s2239_s3 = sshll.u32 %s3776_s24, 4  ;;  %s2240_s3 = int_to_ptr.vmem [resolvable:$true] %s2239_s3 }
 0x3e1   : > { %s2225_s13 = scalar_lea.sflag [#allocation7], %s3391_s5  ;;  %s2990_s4 = scalar_lea.vmem %s2240_s3, 64 }
 0x3e2   : > { %p2991_p3 = scmp.ne.s32.totalorder %s2240_s3, %s2990_s4  ;;  %p3777_p9 = scmp.ne.s32.totalorder %s3764_s25, 0 }
 0x3e3   : > { %s3124_s19 = smov [#allocation14]  }
 0x3e4   : > { %p2992_p8 = pnand %p2991_p3, %p3777_p9  ;;  %s2994_s28 = sshll.u32 %s3124_s19, 4  ;;  %s2995_s28 = int_to_ptr.vmem [resolvable:$false] %s2994_s28 }
 0x3e5   : > { %s2996_s16 = scalar_lea.vmem %s2995_s28, 128  ;;  %p2997_p5 = scmp.lt.s32.totalorder %s2240_s3, %s2995_s28 }
 0x3e6   : > { %p2993_p0 = pneg %p2992_p8  ;;  %p2998_p12 = scmp.lt.s32.totalorder %s2996_s16, %s2990_s4 }
 0x3e8   : > { %p2999_p10 = por %p2998_p12, %p2997_p5 }
 0x3ea   : > { %p3000_p11 = pnand %p2999_p10, %p2993_p0 }
 0x3ec   : > { %3003 = shalt.err (!%p3000_p11)
}
 0x3ed   : > { %s3004_s5 = scalar_lea.hbm %s3675_s15, 64  ;;  %s3008_s27 = scalar_lea.hbm %s3744_s7, 128 }
 0x3ee   : > { %p3005_p7 = scmp.ne.s32.totalorder %s3675_s15, %s3004_s5  ;;  %p3009_p4 = scmp.lt.u32.totalorder %s3675_s15, %s3744_s7 }
 0x3ef   : > { %p3010_p6 = scmp.lt.u32.totalorder %s3008_s27, %s3004_s5  ;;  %p3012_p3 = scmp.lt.u32.totalorder %s3004_s5, %s3675_s15 }
 0x3f0   : > { %p3006_p13 = pnand %p3005_p7, %p3777_p9 }
 0x3f1   : > { %p3011_p2 = por %p3010_p6, %p3009_p4 }
 0x3f2   : > { %p3007_p1 = pneg %p3006_p13 }
 0x3f3   : > { %p3013_p8 = por %p3012_p3, %p3011_p2 }
 0x3f5   : > { %p3014_p0 = pnand %p3013_p8, %p3007_p1 }
 0x3f7   : > { %3017 = shalt.err (!%p3014_p0)
}
 0x3f8   : > { %2678 = dma.vmem_to_hbm [thread:$0]  (%p3777_p9), %s2240_s3, 64, %s3675_s15, %s2225_s13  }
 0x3f9   : > { %s3125_s21 = smov [#allocation15]   ;;  %p3778_p12 = scmp.eq.s32.totalorder %s3195_s6, 1 }
 0x3fa   : > { %s2250_s26 = sshll.u32 %s3125_s21, 4  ;;  %s2251_s26 = int_to_ptr.vmem [resolvable:$true] %s2250_s26 }
 0x3fb   : > { %s3018_s11 = scalar_lea.vmem %s2251_s26, 16  ;;  %s3024_s20 = scalar_lea.vmem %s2251_s26, 32 }
 0x3fc   : > { %p3019_p5 = scmp.ne.s32.totalorder %s2251_s26, %s3018_s11  ;;  %p3025_p7 = scmp.lt.s32.totalorder %s2251_s26, %s2251_s26 }
 0x3fd   : > { %p3026_p13 = scmp.lt.s32.totalorder %s3024_s20, %s3018_s11 }
 0x3fe   : > { %p3020_p10 = pnand %p3019_p5, %p3778_p12 }
 0x3ff   : > { %p3027_p4 = por %p3026_p13, %p3025_p7 }
 0x400   : > { %p3021_p11 = pneg %p3020_p10 }
 0x402   : > { %p3028_p6 = pnand %p3027_p4, %p3021_p11 }
 0x404   : > { %3031 = shalt.err (!%p3028_p6)
}
 0x405   : > { %s3032_s25 = scalar_lea.hbm %s3745_s8, 16  ;;  %p3779_p1 = pmov %p3778_p12 }
 0x406   : > { %p3033_p9 = scmp.ne.s32.totalorder %s3745_s8, %s3032_s25  ;;  %p3038_p8 = scmp.lt.u32.totalorder %s3032_s25, %s3745_s8 }
 0x408   : > { %p3034_p2 = pnand %p3033_p9, %p3779_p1 }
 0x40a   : > { %p3035_p3 = pneg %p3034_p2 }
 0x40c   : > { %p3040_p0 = pnand %p3038_p8, %p3035_p3 }
 0x40e   : > { %3043 = shalt.err (!%p3040_p0)
}
 0x40f   : > { %p3780_p5 = pmov %p3779_p1  ;;  %p3781_p12 = pmov %p3779_p1 }
 0x411   : > { %2680 = dma.vmem_to_hbm [thread:$0]  (%p3780_p5), %s2251_s26, 16, %s3745_s8, [#allocation16]  }
 0x412   : > { %3079 = dma.done.wait (%p3781_p12), [#allocation16], 16   ;;  %p3782_p10 = pmov %p3779_p1 }
 0x414   : > { %3081 = vsyncadd (%p3782_p10), [#allocation16], 4294967280 }
 0x415 PF: > { %s3783_s5 = sld [smem:[#allocation30_spill]]  ;;  %s2266_s18 = sand.u32 1, %s3088_s29  }
 0x416   : > { %p3785_p7 = scmp.ge.s32.totalorder %s3100_s10, 2  ;;  %s2267_s12 = scalar_lea.sflag [#allocation7], %s2266_s18 }
 0x41b   : > { %p3784_p11 = scmp.ne.s32.totalorder %s3783_s5, 0 }
 0x41d   : > { %p2702_p13 = pnand %p3785_p7, %p3784_p11 }
 0x41f   : > { %3083 = dma.done.wait (!%p2702_p13), %s2267_s12, 64  }
 0x420   : > { %3085 = vsyncadd (!%p2702_p13), %s2267_s12, 4294967232  ;;  %p28_p4 = scmp.ge.s32.totalorder %s3285_s23, 4   ;;  %s3786_s29 = smov %s3092_s30 }
 0x421   : > { %s3787_s30 = smov %s3096_s9  ;;  %s3788_s9 = smov %s3313_s17 }
 0x422   : > { %s3789_s10 = smov %s3285_s23  ;;  %30 = sbr.rel (!%p28_p4) target bundleno = 14 (0xe), region = 149 }
 0x429   :  { %2272 = vsyncpa [#allocation6], 1 }
 0x42a   :  { %2274 = vsyncpa [#allocation6 + $0x1], 1 }
 0x42b   :  { %2275 = vsyncpa [#allocation9], 1 }
 0x42c   :  { %2277 = vsyncpa [#allocation9 + $0x1], 1 }
 0x42d   :  { %2278 = vsyncpa [#allocation12], 1 }
 0x42e   :  { %2279 = vsyncpa [#allocation7], 1 }
 0x42f   :  { %2281 = vsyncpa [#allocation7 + $0x1], 1 }
 0x430   :  { %2282 = vsyncpa [#allocation16], 1 }
 0x431   :  { %2283 = vsyncmov [#allocation3] }
 0x434   :  { %s2284_s10 = vpop.sfrf %2283 }
 0x435   :  { %p2521_p6 = scmp.ne.s32.totalorder %s2284_s10, 0 }
 0x437   :  { %2288 = shalt.err (%p2521_p6)  }
 0x438   :  { %2290 = vsyncmov [#allocation3 + $0x1] }
 0x43b   :  { %s2291_s6 = vpop.sfrf %2290 }
 0x43c   :  { %p2522_p9 = scmp.ne.s32.totalorder %s2291_s6, 0 }
 0x43e   :  { %2295 = shalt.err (%p2522_p9)  }

</bundles_post_ra>
